<compile_context>
chip_gen: v5e
topology: v5e:2x2
jax: 0.10.0
libtpu: 0.0.40
codegen_flags: <defaults>
</compile_context>

<pallas_src>
import functools

import jax
import jax.numpy as jnp
from jax.experimental import pallas as pl
from jax.experimental.pallas import tpu as pltpu

EPS = 1e-5
_VMEM_LIMIT = 32 * 1024 * 1024  # safe on v5e/v6e/v7x; re-derive when using large tiles


def _conv3x3_kernel(x_ref, w_ref, scale_ref, shift_ref, y_ref, stats_ref, pad_scr,
                    *, fuse_input_bn_relu):
    """One batch element: [optional folded BN+ReLU] -> 3x3 conv as a single im2col matmul.

    x_ref     : (H, W, Cin)      input tile (batch dim squeezed by the BlockSpec)
    w_ref     : (9*Cin, Cout)    conv weight, rows ordered (dy, dx, cin)
    scale_ref : (1, Cin)         folded BN scale of the *previous* layer
    shift_ref : (1, Cin)         folded BN shift of the *previous* layer
    y_ref     : (H, W, Cout)     pre-BN conv output tile
    stats_ref : (2, Cout)        per-tile [sum(y), sum(y*y)] over (H, W)
    pad_scr   : (H+2, W+2, Cin)  VMEM scratch holding the halo-padded tile
    """
    H, W, Cin = x_ref.shape
    Cout = y_ref.shape[-1]

    x = x_ref[...]
    if fuse_input_bn_relu:
        # previous conv's BatchNorm folded to a single scale/shift, then ReLU (f32 VPU)
        x = jnp.maximum(x * scale_ref[...] + shift_ref[...], 0.0)

    # Build the halo-padded tile: zero only the top/bottom halo rows (thin slab stores)
    # and write the interior together with its left/right halo in one slab store.
    zrow = jnp.zeros((1, W + 2, Cin), jnp.float32)
    zcol = jnp.zeros((H, 1, Cin), jnp.float32)
    pad_scr[0:1, :, :] = zrow
    pad_scr[H + 1:H + 2, :, :] = zrow
    pad_scr[1:H + 1, :, :] = jnp.concatenate([zcol, x, zcol], axis=1)

    # im2col: pack the three dx taps once into a channel-widened slab; the dy taps are
    # cheap leading-axis slices and the (H, W, 3Cin) -> (H*W, 3Cin) reshapes are
    # layout-preserving (W is a multiple of 8).  Column order is (dy, dx, cin).
    wide = jnp.concatenate([pad_scr[:, dx:dx + W, :] for dx in range(3)], axis=-1)
    patches = jnp.concatenate(
        [wide[dy:dy + H, :, :].reshape(H * W, 3 * Cin) for dy in range(3)], axis=-1)

    # One MXU matmul, K = 9*Cin.  The conv bias is intentionally dropped: the
    # training-mode BatchNorm that follows subtracts the batch mean, cancelling it.
    y = jnp.dot(patches, w_ref[...], preferred_element_type=jnp.float32)  # (H*W, Cout)

    y_ref[...] = y.reshape(H, W, Cout)

    # Partial BatchNorm statistics in the same pass (finished outside the kernel).
    s1 = jnp.sum(y, axis=0, keepdims=True)
    s2 = jnp.sum(y * y, axis=0, keepdims=True)
    stats_ref[...] = jnp.concatenate([s1, s2], axis=0)


def _conv3x3_layer(x_nhwc, w_hwio, in_scale, in_shift, *, fuse_input_bn_relu):
    """Conv over the whole batch; returns pre-BN output plus batch mean/var per channel."""
    N, H, W, Cin = x_nhwc.shape
    Cout = w_hwio.shape[-1]
    w2d = w_hwio.reshape(9 * Cin, Cout).astype(jnp.float32)

    kernel = functools.partial(_conv3x3_kernel, fuse_input_bn_relu=fuse_input_bn_relu)
    y, stats = pl.pallas_call(
        kernel,
        out_shape=(jax.ShapeDtypeStruct((N, H, W, Cout), jnp.float32),
                   jax.ShapeDtypeStruct((N, 2, Cout), jnp.float32)),
        grid=(N,),
        in_specs=[
            pl.BlockSpec((None, H, W, Cin), lambda n: (n, 0, 0, 0)),
            pl.BlockSpec((9 * Cin, Cout), lambda n: (0, 0)),
            pl.BlockSpec((1, Cin), lambda n: (0, 0)),
            pl.BlockSpec((1, Cin), lambda n: (0, 0)),
        ],
        out_specs=(
            pl.BlockSpec((None, H, W, Cout), lambda n: (n, 0, 0, 0)),
            pl.BlockSpec((None, 2, Cout), lambda n: (n, 0, 0)),
        ),
        scratch_shapes=[pltpu.VMEM((H + 2, W + 2, Cin), jnp.float32)],
        compiler_params=pltpu.CompilerParams(
            dimension_semantics=("parallel",),   # v7x: split the batch across both TCs
            vmem_limit_bytes=_VMEM_LIMIT,
        ),
    )(x_nhwc, w2d, in_scale, in_shift)

    # Finish the training-mode BatchNorm reduction: global batch stats, biased variance,
    # computed as E[y^2] - mean^2 from the single-pass in-kernel sums.
    count = jnp.float32(N * H * W)
    total = jnp.sum(stats, axis=0)               # (2, Cout)
    mean = total[0] / count
    var = total[1] / count - mean * mean
    return y, mean, var


def _fold_bn(mean, var, gamma, beta):
    """gamma, beta: (1, C).  Returns (scale, shift) with y_norm = y*scale + shift."""
    inv_std = jax.lax.rsqrt(var + EPS)
    scale = gamma.reshape(-1) * inv_std
    shift = beta.reshape(-1) - mean * scale
    return (scale.reshape(1, -1).astype(jnp.float32),
            shift.reshape(1, -1).astype(jnp.float32))


def _bn_relu_kernel(y_ref, scale_ref, shift_ref, o_ref):
    # y_ref: (H, W, C); scale/shift: (1, C) folded BatchNorm affine
    o_ref[...] = jnp.maximum(y_ref[...] * scale_ref[...] + shift_ref[...], 0.0)


def _bn_relu_layer(y, scale, shift):
    N, H, W, C = y.shape
    return pl.pallas_call(
        _bn_relu_kernel,
        out_shape=jax.ShapeDtypeStruct((N, H, W, C), jnp.float32),
        grid=(N,),
        in_specs=[
            pl.BlockSpec((None, H, W, C), lambda n: (n, 0, 0, 0)),
            pl.BlockSpec((1, C), lambda n: (0, 0)),
            pl.BlockSpec((1, C), lambda n: (0, 0)),
        ],
        out_specs=pl.BlockSpec((None, H, W, C), lambda n: (n, 0, 0, 0)),
        compiler_params=pltpu.CompilerParams(
            dimension_semantics=("parallel",),
            vmem_limit_bytes=_VMEM_LIMIT,
        ),
    )(y, scale, shift)


def double_conv(x_nchw, params):
    """x_nchw: (N, Cin, H, W) float32 -> (N, Cout, H, W) float32."""
    N, Cin, H, W = x_nchw.shape
    x_nhwc = jnp.transpose(x_nchw, (0, 2, 3, 1))

    one = jnp.ones((1, Cin), jnp.float32)
    zero = jnp.zeros((1, Cin), jnp.float32)

    # conv1 -> (pre-BN y1, batch stats).  Bias b1 is dropped (cancelled by BN1).
    y1, mean1, var1 = _conv3x3_layer(x_nhwc, params["w1"], one, zero,
                                     fuse_input_bn_relu=False)
    scale1, shift1 = _fold_bn(mean1, var1, params["g1"], params["bt1"])

    # BN1 + ReLU folded into the input path of conv2.  Bias b2 dropped likewise.
    y2, mean2, var2 = _conv3x3_layer(y1, params["w2"], scale1, shift1,
                                     fuse_input_bn_relu=True)
    scale2, shift2 = _fold_bn(mean2, var2, params["g2"], params["bt2"])

    # final BN2 + ReLU
    out_nhwc = _bn_relu_layer(y2, scale2, shift2)
    return jnp.transpose(out_nhwc, (0, 3, 1, 2))


def ref_double_conv(x_nchw, params):
    """Pure-JAX reference (NCHW, lax.conv), same training-mode BN semantics, with biases."""
    def conv(x, w_hwio, b):
        w_oihw = jnp.transpose(w_hwio, (3, 2, 0, 1))
        y = jax.lax.conv_general_dilated(
            x, w_oihw, window_strides=(1, 1), padding=[(1, 1), (1, 1)],
            dimension_numbers=("NCHW", "OIHW", "NCHW"))
        return y + b.reshape(1, -1, 1, 1)

    def bn_relu(y, g, bt):
        mean = jnp.mean(y, axis=(0, 2, 3), keepdims=True)
        var = jnp.mean((y - mean) ** 2, axis=(0, 2, 3), keepdims=True)
        yn = (y - mean) * jax.lax.rsqrt(var + EPS)
        return jnp.maximum(yn * g.reshape(1, -1, 1, 1) + bt.reshape(1, -1, 1, 1), 0.0)

    y = bn_relu(conv(x_nchw, params["w1"], params["b1"].reshape(-1)),
                params["g1"].reshape(-1), params["bt1"].reshape(-1))
    y = bn_relu(conv(y, params["w2"], params["b2"].reshape(-1)),
                params["g2"].reshape(-1), params["bt2"].reshape(-1))
    return y


def init_params(key, in_channels, out_channels):
    ks = jax.random.split(key, 8)
    f32 = jnp.float32
    return {
        # conv weights stored HWIO = (3, 3, Cin, Cout)
        "w1": 0.1 * jax.random.normal(ks[0], (3, 3, in_channels, out_channels), f32),
        "b1": 0.1 * jax.random.normal(ks[1], (1, out_channels), f32),
        "g1": 1.0 + 0.1 * jax.random.normal(ks[2], (1, out_channels), f32),
        "bt1": 0.1 * jax.random.normal(ks[3], (1, out_channels), f32),
        "w2": 0.1 * jax.random.normal(ks[4], (3, 3, out_channels, out_channels), f32),
        "b2": 0.1 * jax.random.normal(ks[5], (1, out_channels), f32),
        "g2": 1.0 + 0.1 * jax.random.normal(ks[6], (1, out_channels), f32),
        "bt2": 0.1 * jax.random.normal(ks[7], (1, out_channels), f32),
    }


if __name__ == "__main__":
    key = jax.random.PRNGKey(0)
    k_x, k_p = jax.random.split(key)

    N, Cin, Cout, H, W = 2, 4, 8, 16, 16
    x = jax.random.normal(k_x, (N, Cin, H, W), jnp.float32)
    params = init_params(k_p, Cin, Cout)

    out = jax.block_until_ready(double_conv(x, params))
    ref = jax.block_until_ready(ref_double_conv(x, params))

    assert out.shape == (N, Cout, H, W)
    assert jnp.allclose(out, ref, atol=1e-3, rtol=1e-3), "mismatch vs reference"
    print("KERNEL_OK")
</pallas_src>

<mosaic_0001>
module attributes {stable_mosaic.version = 11 : i64} {
  func.func @_conv3x3_kernel(%arg0: i32, %arg1: memref<1x16x16x4xf32, #tpu.memory_space<vmem>>, %arg2: memref<36x8xf32, #tpu.memory_space<vmem>>, %arg3: memref<1x4xf32, #tpu.memory_space<vmem>>, %arg4: memref<1x4xf32, #tpu.memory_space<vmem>>, %arg5: memref<1x16x16x8xf32, #tpu.memory_space<vmem>>, %arg6: memref<1x2x8xf32, #tpu.memory_space<vmem>>, %arg7: memref<18x18x4xf32, #tpu.memory_space<vmem>>) attributes {dimension_semantics = [#tpu.dimension_semantics<parallel>], iteration_bounds = array<i64: 2>, scalar_prefetch = 0 : i64, scratch_operands = 1 : i64, tpu.core_type = #tpu.core_type<tc>, window_params = [{transform_indices = @transform_0, window_bounds = array<i64: 1, 16, 16, 4>}, {pipeline_mode = #tpu.pipeline_mode<synchronous>, transform_indices = @transform_1, window_bounds = array<i64: 36, 8>}, {pipeline_mode = #tpu.pipeline_mode<synchronous>, transform_indices = @transform_2, window_bounds = array<i64: 1, 4>}, {pipeline_mode = #tpu.pipeline_mode<synchronous>, transform_indices = @transform_3, window_bounds = array<i64: 1, 4>}, {transform_indices = @transform_4, window_bounds = array<i64: 1, 16, 16, 8>}, {transform_indices = @transform_5, window_bounds = array<i64: 1, 2, 8>}]} {
    %c0 = arith.constant 0 : index
    %c0_0 = arith.constant 0 : index
    %c0_1 = arith.constant 0 : index
    %c0_2 = arith.constant 0 : index
    %0 = vector.load %arg1[%c0, %c0_0, %c0_1, %c0_2] : memref<1x16x16x4xf32, #tpu.memory_space<vmem>>, vector<1x16x16x4xf32>
    %1 = vector.shape_cast %0 : vector<1x16x16x4xf32> to vector<16x16x4xf32>
    %cst = arith.constant 0.000000e+00 : f32
    %2 = vector.broadcast %cst : f32 to vector<1x18x4xf32>
    %cst_3 = arith.constant 0.000000e+00 : f32
    %3 = vector.broadcast %cst_3 : f32 to vector<16x1x4xf32>
    %c0_4 = arith.constant 0 : index
    %c0_5 = arith.constant 0 : index
    %c0_6 = arith.constant 0 : index
    %4 = vector.load %arg7[%c0_4, %c0_5, %c0_6] : memref<18x18x4xf32, #tpu.memory_space<vmem>>, vector<1x18x4xf32>
    tpu.vector_store %arg7[%c0_4, %c0_5, %c0_6], %2 {strides = array<i32>} : memref<18x18x4xf32, #tpu.memory_space<vmem>>, vector<1x18x4xf32>,
    %c17 = arith.constant 17 : index
    %c0_7 = arith.constant 0 : index
    %c0_8 = arith.constant 0 : index
    %5 = vector.load %arg7[%c17, %c0_7, %c0_8] : memref<18x18x4xf32, #tpu.memory_space<vmem>>, vector<1x18x4xf32>
    tpu.vector_store %arg7[%c17, %c0_7, %c0_8], %2 {strides = array<i32>} : memref<18x18x4xf32, #tpu.memory_space<vmem>>, vector<1x18x4xf32>,
    %6 = tpu.concatenate %3, %1, %3 in 1 : vector<16x1x4xf32>, vector<16x16x4xf32>, vector<16x1x4xf32> -> vector<16x18x4xf32>
    %c1 = arith.constant 1 : index
    %c0_9 = arith.constant 0 : index
    %c0_10 = arith.constant 0 : index
    %7 = vector.load %arg7[%c1, %c0_9, %c0_10] : memref<18x18x4xf32, #tpu.memory_space<vmem>>, vector<16x18x4xf32>
    tpu.vector_store %arg7[%c1, %c0_9, %c0_10], %6 {strides = array<i32>} : memref<18x18x4xf32, #tpu.memory_space<vmem>>, vector<16x18x4xf32>,
    %c0_11 = arith.constant 0 : index
    %c0_12 = arith.constant 0 : index
    %c0_13 = arith.constant 0 : index
    %8 = vector.load %arg7[%c0_11, %c0_12, %c0_13] : memref<18x18x4xf32, #tpu.memory_space<vmem>>, vector<18x16x4xf32>
    %c0_14 = arith.constant 0 : index
    %c1_15 = arith.constant 1 : index
    %c0_16 = arith.constant 0 : index
    %9 = vector.load %arg7[%c0_14, %c1_15, %c0_16] : memref<18x18x4xf32, #tpu.memory_space<vmem>>, vector<18x16x4xf32>
    %c0_17 = arith.constant 0 : index
    %c2 = arith.constant 2 : index
    %c0_18 = arith.constant 0 : index
    %10 = vector.load %arg7[%c0_17, %c2, %c0_18] : memref<18x18x4xf32, #tpu.memory_space<vmem>>, vector<18x16x4xf32>
    %11 = tpu.concatenate %8, %9, %10 in 2 : vector<18x16x4xf32>, vector<18x16x4xf32>, vector<18x16x4xf32> -> vector<18x16x12xf32>
    %12 = vector.extract_strided_slice %11 {offsets = [0, 0, 0], sizes = [16, 16, 12], strides = [1, 1, 1]} : vector<18x16x12xf32> to vector<16x16x12xf32>
    %13 = vector.shape_cast %12 : vector<16x16x12xf32> to vector<256x12xf32>
    %14 = vector.extract_strided_slice %11 {offsets = [1, 0, 0], sizes = [16, 16, 12], strides = [1, 1, 1]} : vector<18x16x12xf32> to vector<16x16x12xf32>
    %15 = vector.shape_cast %14 : vector<16x16x12xf32> to vector<256x12xf32>
    %16 = vector.extract_strided_slice %11 {offsets = [2, 0, 0], sizes = [16, 16, 12], strides = [1, 1, 1]} : vector<18x16x12xf32> to vector<16x16x12xf32>
    %17 = vector.shape_cast %16 : vector<16x16x12xf32> to vector<256x12xf32>
    %18 = tpu.concatenate %13, %15, %17 in 1 : vector<256x12xf32>, vector<256x12xf32>, vector<256x12xf32> -> vector<256x36xf32>
    %c0_19 = arith.constant 0 : index
    %c0_20 = arith.constant 0 : index
    %19 = vector.load %arg2[%c0_19, %c0_20] : memref<36x8xf32, #tpu.memory_space<vmem>>, vector<36x8xf32>
    %cst_21 = arith.constant dense<0.000000e+00> : vector<256x8xf32>
    %20 = tpu.matmul %18, %19, %cst_21 {dimension_numbers = #tpu.dot_dimension_numbers<[1], [0], [0], [1], [0, 0, 1, 1], [], []>} : vector<256x36xf32>, vector<36x8xf32>, vector<256x8xf32> -> vector<256x8xf32>
    %21 = vector.shape_cast %20 : vector<256x8xf32> to vector<16x16x8xf32>
    %c0_22 = arith.constant 0 : index
    %c0_23 = arith.constant 0 : index
    %c0_24 = arith.constant 0 : index
    %c0_25 = arith.constant 0 : index
    %22 = vector.load %arg5[%c0_22, %c0_23, %c0_24, %c0_25] : memref<1x16x16x8xf32, #tpu.memory_space<vmem>>, vector<1x16x16x8xf32>
    %23 = vector.shape_cast %22 : vector<1x16x16x8xf32> to vector<16x16x8xf32>
    %24 = vector.shape_cast %21 : vector<16x16x8xf32> to vector<1x16x16x8xf32>
    tpu.vector_store %arg5[%c0_22, %c0_23, %c0_24, %c0_25], %24 {strides = array<i32>} : memref<1x16x16x8xf32, #tpu.memory_space<vmem>>, vector<1x16x16x8xf32>,
    %cst_26 = arith.constant dense<0.000000e+00> : vector<8xf32>
    %25 = vector.multi_reduction <add>, %20, %cst_26 [0] : vector<256x8xf32> to vector<8xf32>
    %26 = vector.shape_cast %25 : vector<8xf32> to vector<1x8xf32>
    %27 = arith.mulf %20, %20 : vector<256x8xf32>
    %cst_27 = arith.constant dense<0.000000e+00> : vector<8xf32>
    %28 = vector.multi_reduction <add>, %27, %cst_27 [0] : vector<256x8xf32> to vector<8xf32>
    %29 = vector.shape_cast %28 : vector<8xf32> to vector<1x8xf32>
    %30 = tpu.concatenate %26, %29 in 0 : vector<1x8xf32>, vector<1x8xf32> -> vector<2x8xf32>
    %c0_28 = arith.constant 0 : index
    %c0_29 = arith.constant 0 : index
    %c0_30 = arith.constant 0 : index
    %31 = vector.load %arg6[%c0_28, %c0_29, %c0_30] : memref<1x2x8xf32, #tpu.memory_space<vmem>>, vector<1x2x8xf32>
    %32 = vector.shape_cast %31 : vector<1x2x8xf32> to vector<2x8xf32>
    %33 = vector.shape_cast %30 : vector<2x8xf32> to vector<1x2x8xf32>
    tpu.vector_store %arg6[%c0_28, %c0_29, %c0_30], %33 {strides = array<i32>} : memref<1x2x8xf32, #tpu.memory_space<vmem>>, vector<1x2x8xf32>,
    return
  }
  func.func @transform_0(%arg0: i32) -> (i32, i32, i32, i32) {
    %c0_i32 = arith.constant 0 : i32
    %c0_i32_0 = arith.constant 0 : i32
    %c0_i32_1 = arith.constant 0 : i32
    %c0_i32_2 = arith.constant 0 : i32
    return %arg0, %c0_i32, %c0_i32_0, %c0_i32_1 : i32, i32, i32, i32
  }
  func.func @transform_1(%arg0: i32) -> (i32, i32) {
    %c0_i32 = arith.constant 0 : i32
    %c0_i32_0 = arith.constant 0 : i32
    %c0_i32_1 = arith.constant 0 : i32
    return %c0_i32, %c0_i32_0 : i32, i32
  }
  func.func @transform_2(%arg0: i32) -> (i32, i32) {
    %c0_i32 = arith.constant 0 : i32
    %c0_i32_0 = arith.constant 0 : i32
    %c0_i32_1 = arith.constant 0 : i32
    return %c0_i32, %c0_i32_0 : i32, i32
  }
  func.func @transform_3(%arg0: i32) -> (i32, i32) {
    %c0_i32 = arith.constant 0 : i32
    %c0_i32_0 = arith.constant 0 : i32
    %c0_i32_1 = arith.constant 0 : i32
    return %c0_i32, %c0_i32_0 : i32, i32
  }
  func.func @transform_4(%arg0: i32) -> (i32, i32, i32, i32) {
    %c0_i32 = arith.constant 0 : i32
    %c0_i32_0 = arith.constant 0 : i32
    %c0_i32_1 = arith.constant 0 : i32
    %c0_i32_2 = arith.constant 0 : i32
    return %arg0, %c0_i32, %c0_i32_0, %c0_i32_1 : i32, i32, i32, i32
  }
  func.func @transform_5(%arg0: i32) -> (i32, i32, i32) {
    %c0_i32 = arith.constant 0 : i32
    %c0_i32_0 = arith.constant 0 : i32
    %c0_i32_1 = arith.constant 0 : i32
    return %arg0, %c0_i32, %c0_i32_0 : i32, i32, i32
  }
}

</mosaic_0001>

<bundles_post_ra>
// kernel: tpu_custom_call.1
= control target key start
LH: loop header
LB: loop body
LE: loop exit
PB: predicated region body
PF: predicated region fallthrough
CT: control target
= control target key end

     0   :  { %11 = vsyncpa [#allocation4], 0  ;;  %s2973_s0 = inlined_call_operand.vmem [shape: f32[2,16,16,4], index: 0, kind: input, shape index: {}]   ;;  %s2974_s1 = inlined_call_operand.vmem [shape: f32[36,8], index: 1, kind: input, shape index: {}]   ;;  %s2975_s2 = inlined_call_operand.vmem [shape: f32[1,4], index: 2, kind: input, shape index: {}]   ;;  %s2976_s3 = inlined_call_operand.vmem [shape: f32[1,4], index: 3, kind: input, shape index: {}]   ;;  %s2977_s4 = inlined_call_operand.vmem [shape: f32[2,16,16,8], index: 4, kind: output, shape index: {0}]   ;;  %s2978_s5 = inlined_call_operand.hbm [shape: f32[2,2,8], index: 5, kind: output, shape index: {1}]  }
   0x1   :  { %13 = vsyncpa [#allocation4 + $0x1], 0  ;;  %s1986_s18 = smov 0   ;;  %s1988_s19 = smov 0  }
   0x2   :  { %s1990_s20 = smov 0   ;;  %s1992_s21 = smov 0  }
   0x3 LB: > { %s2007_s2 = sadd.s32 4294967295, %s1949_s21   ;;  %s1780_s3 = sadd.s32 4294967294, %s1949_s21   ;;  %s1949_s21 = sphi %s1992_s21, %s2984_s21   ;;  %s1945_s20 = sphi %s1990_s20, %s2983_s20   ;;  %s1941_s19 = sphi %s1988_s19, %s2982_s19   ;;  %s1937_s18 = sphi %s1986_s18, %s2981_s18  }
   0x4   : > { %s2011_s22 = sadd.s32 1, %s1949_s21   ;;  %s141_s23 = sadd.s32 1, %s1945_s20 }
   0x5   : > { %s138_s24 = ssub.s32 %s1949_s21, %s2011_s22  ;;  %p151_p0 = scmp.ne.s32.totalorder %s1945_s20, %s1941_s19 }
   0x6   : > { %p139_p1 = scmp.eq.s32.totalorder %s138_s24, 0  ;;  %p152_p2 = scmp.eq.s32.totalorder %s2007_s2, 1 }
   0x7   : > { %p157_p3 = scmp.ne.s32.totalorder %s1941_s19, %s1937_s18  ;;  %p158_p4 = scmp.eq.s32.totalorder %s1780_s3, 1 }
   0x8   : > { %s2022_s25 = scalar_select %p139_p1, %s1945_s20, %s141_s23  }
   0x9   : > { %p2024_p5 = por %p152_p2, %p151_p0  ;;  %p2028_p6 = por %p158_p4, %p157_p3 }
   0xa   : > { %p1783_p7 = scmp.ge.s32.totalorder %s1949_s21, 1  ;;  %p193_p8 = scmp.lt.s32.totalorder %s1949_s21, 3 }
   0xc   : > { %p194_p9 = pnand %p1783_p7, %p193_p8 }
   0xd   : > { %p226_p10 = scmp.lt.s32.totalorder (!%p194_p9), %s2007_s2, 1  ;;  %s1952_s8 = smov (!%p194_p9), 4  }
   0xe   : > { %197 = sbr.rel (%p194_p9) target bundleno = 758 (0x2f6), region = 36  ;;  %s1953_s9 = smov (!%p194_p9), 8  }
   0xf   : > { %s1954_s10 = smov (!%p194_p9), 12   ;;  %s1955_s11 = smov (!%p194_p9), 24  }
  0x10   : > { %s1907_s24 = scalar_lea.hbm (!%p194_p9), %s2978_s5, 4 }
  0x13   : > { %vm268_vm0 = vcmask 31744   ;;  %v1951_v0 = vmov 0.0   ;;  %vm271_vm1 = vcmask 25600   ;;  %s2038_s28 = scalar_select %p226_p10, %s2007_s2, 1  ;;  %vm309_vm2 = vcmask 1040384  }
  0x14   : > { %269 = vst.msk [vmem:[#allocation2] sm:$0xff] %vm268_vm0, %v1951_v0  ;;  %vm919_vm3 = vcmask 64512   ;;  %vm1350_vm4 = vcmask 1043456   ;;  %vm1182_vm5 = vcmask 97280   ;;  %vm1215_vm6 = vcmask 195584  }
  0x15   : > { %270 = vst.msk [vmem:[#allocation2 + $0x8] sm:$0xff] %vm268_vm0, %v1951_v0  ;;  %s1826_s29 = sshll.u32 %s2038_s28, 8  ;;  %vm1253_vm7 = vcmask 293888   ;;  %s223_s28 = sand.u32 1, %s1941_s19   ;;  %vm1670_vm8 = vcmask 58368  }
  0x16   : > { %274 = vst.msk [vmem:[#allocation2 + $0x198] sm:$0xff] %vm268_vm0, %v1951_v0  ;;  %s2049_s7 = scalar_lea.vmem %s2973_s0, %s1826_s29 }
  0x17   : > { %275 = vst.msk [vmem:[#allocation2 + $0x1a0] sm:$0xff] %vm268_vm0, %v1951_v0  ;;  %v238_v1 = vld [vmem:[%s2049_s7 + $0x10] sm:$0xff]  ;;  %v239_v2 = vld [vmem:[%s2049_s7 + $0x18] sm:$0xff]  ;;  %v236_v3 = vld [vmem:[%s2049_s7] sm:$0xff] }
  0x18   : > { %272 = vst.msk [vmem:[#allocation2 + $0x10] sm:$0x3] %vm271_vm1, %v1951_v0  ;;  %v313_v4 = vrot.slane %v238_v1, 7  ;;  %v314_v5 = vrot.slane %v239_v2, 7  ;;  %v237_v6 = vld [vmem:[%s2049_s7 + $0x8] sm:$0xff]  ;;  %v310_v7 = vrot.slane %v236_v3, 7 }
  0x19   : > { %276 = vst.msk [vmem:[#allocation2 + $0x1a8] sm:$0x3] %vm271_vm1, %v1951_v0  ;;  %v240_v8 = vld [vmem:[%s2049_s7 + $0x20] sm:$0xff]  ;;  %v241_v9 = vld [vmem:[%s2049_s7 + $0x28] sm:$0xff]  ;;  %v311_v10 = vrot.slane %v237_v6, 7  ;;  %v242_v13 = vld [vmem:[%s2049_s7 + $0x30] sm:$0xff] }
  0x1a   : > { %v316_v11 = vrot.slane %v240_v8, 7  ;;  %v317_v12 = vrot.slane %v241_v9, 7  ;;  %v243_v14 = vld [vmem:[%s2049_s7 + $0x38] sm:$0xff]  ;;  %v315_v16 = vsel %vm309_vm2, %v313_v4, %v314_v5  ;;  %v407_v17 = vsel %vm309_vm2, 0.0, %v313_v4  ;;  %v246_v24 = vld [vmem:[%s2049_s7 + $0x50] sm:$0xff]  ;;  %v244_v28 = vld [vmem:[%s2049_s7 + $0x40] sm:$0xff] }
  0x1b   : > { %v406_v18 = vsel %vm309_vm2, 0.0, %v310_v7  ;;  %442 = vst.msk [vmem:[#allocation2 + $0x30] sm:$0xff] %vm268_vm0, %v407_v17  ;;  %v312_v19 = vsel %vm309_vm2, %v310_v7, %v311_v10  ;;  %v319_v21 = vrot.slane %v242_v13, 7  ;;  %v320_v22 = vrot.slane %v243_v14, 7  ;;  %v247_v26 = vld [vmem:[%s2049_s7 + $0x58] sm:$0xff]  ;;  %v245_v29 = vld [vmem:[%s2049_s7 + $0x48] sm:$0xff] }
  0x1c   : > { %v523_v15 = vld [vmem:[#allocation2 + $0x1] sm:$0xff]  ;;  %443 = vst.msk [vmem:[#allocation2 + $0x38] sm:$0xff] %vm268_vm0, %v315_v16  ;;  %v408_v20 = vsel %vm309_vm2, 0.0, %v316_v11  ;;  %v318_v23 = vsel %vm309_vm2, %v316_v11, %v317_v12  ;;  %v423_v25 = vsel %vm309_vm2, %v314_v5, 0.0  ;;  %v422_v27 = vsel %vm309_vm2, %v311_v10, 0.0  ;;  %v250_v53 = vld [vmem:[%s2049_s7 + $0x70] sm:$0xff] }
  0x1d   : > { %631 = vrot.lane.b32.xlu0 %v523_v15, %s1952_s8  ;;  %439 = vst.msk [vmem:[#allocation2 + $0x18] sm:$0xff] %vm268_vm0, %v406_v18  ;;  %v321_v31 = vsel %vm309_vm2, %v319_v21, %v320_v22  ;;  %v325_v32 = vrot.slane %v246_v24, 7  ;;  %v425_v33 = vsel %vm309_vm2, %v320_v22, 0.0  ;;  %v326_v34 = vrot.slane %v247_v26, 7  ;;  %v248_v35 = vld [vmem:[%s2049_s7 + $0x60] sm:$0xff]  ;;  %v249_v39 = vld [vmem:[%s2049_s7 + $0x68] sm:$0xff] }
  0x1e   : > { %440 = vst.msk [vmem:[#allocation2 + $0x20] sm:$0xff] %vm268_vm0, %v312_v19  ;;  %v409_v36 = vsel %vm309_vm2, 0.0, %v319_v21  ;;  %v322_v37 = vrot.slane %v244_v28, 7  ;;  %v323_v38 = vrot.slane %v245_v29, 7  ;;  %v424_v41 = vsel %vm309_vm2, %v317_v12, 0.0  ;;  %v252_v48 = vld [vmem:[%s2049_s7 + $0x80] sm:$0xff] }
  0x1f   : > { %445 = vst.msk [vmem:[#allocation2 + $0x48] sm:$0xff] %vm268_vm0, %v408_v20  ;;  %v524_v30 = vld [vmem:[#allocation2 + $0x9] sm:$0xff]  ;;  %v411_v42 = vsel %vm309_vm2, 0.0, %v325_v32  ;;  %v327_v44 = vsel %vm309_vm2, %v325_v32, %v326_v34  ;;  %v328_v45 = vrot.slane %v248_v35, 7  ;;  %v329_v46 = vrot.slane %v249_v39, 7  ;;  %v251_v54 = vld [vmem:[%s2049_s7 + $0x78] sm:$0xff] }
  0x20   : > { %446 = vst.msk [vmem:[#allocation2 + $0x50] sm:$0xff] %vm268_vm0, %v318_v23  ;;  %v324_v47 = vsel %vm309_vm2, %v322_v37, %v323_v38  ;;  %v426_v49 = vsel %vm309_vm2, %v323_v38, 0.0  ;;  %v253_v50 = vld [vmem:[%s2049_s7 + $0x88] sm:$0xff]  ;;  %v410_v52 = vsel %vm309_vm2, 0.0, %v322_v37  ;;  %v334_v57 = vrot.slane %v252_v48, 7  ;;  %v254_v0 = vld [vmem:[%s2049_s7 + $0x90] sm:$0xff] }
  0x21   : > { %444 = vst.msk [vmem:[#allocation2 + $0x40] sm:$0x3] %vm271_vm1, %v423_v25  ;;  %v330_v56 = vsel %vm309_vm2, %v328_v45, %v329_v46  ;;  %v428_v58 = vsel %vm309_vm2, %v329_v46, 0.0  ;;  %v412_v59 = vsel %vm309_vm2, 0.0, %v328_v45  ;;  %v335_v60 = vrot.slane %v253_v50, 7  ;;  %v255_v1 = vld [vmem:[%s2049_s7 + $0x98] sm:$0xff] }
  0x22   : > { %441 = vst.msk [vmem:[#allocation2 + $0x28] sm:$0x3] %vm271_vm1, %v422_v27  ;;  %v331_v62 = vrot.slane %v250_v53, 7  ;;  %v332_v63 = vrot.slane %v251_v54, 7  ;;  %v427_v2 = vsel %vm309_vm2, %v326_v34, 0.0  ;;  %v414_v3 = vsel %vm309_vm2, 0.0, %v334_v57 }
  0x23   : > { %v527_v40 = vld [vmem:[#allocation2 + $0x31] sm:$0xff]  ;;  %449 = vst.msk [vmem:[#allocation2 + $0x68] sm:$0xff] %vm268_vm0, %v321_v31  ;;  %v336_v4 = vsel %vm309_vm2, %v334_v57, %v335_v60  ;;  %v337_v5 = vrot.slane %v254_v0, 7  ;;  %v338_v6 = vrot.slane %v255_v1, 7  ;;  %v256_v16 = vld [vmem:[%s2049_s7 + $0xa0] sm:$0xff]  ;;  %v257_v17 = vld [vmem:[%s2049_s7 + $0xa8] sm:$0xff] }
  0x24   : > { %639 = vrot.lane.b32.xlu2 %v527_v40, %s1952_s8  ;;  %450 = vst.msk [vmem:[#allocation2 + $0x70] sm:$0x3] %vm271_vm1, %v425_v33  ;;  %v333_v7 = vsel %vm309_vm2, %v331_v62, %v332_v63  ;;  %v429_v9 = vsel %vm309_vm2, %v332_v63, 0.0  ;;  %v413_v11 = vsel %vm309_vm2, 0.0, %v331_v62  ;;  %v258_v12 = vld [vmem:[%s2049_s7 + $0xb0] sm:$0xff]  ;;  %v259_v13 = vld [vmem:[%s2049_s7 + $0xb8] sm:$0xff] }
  0x25   : > { %633 = vrot.lane.b32.xlu0 %v524_v30, %s1952_s8  ;;  %v525_v43 = vld [vmem:[#allocation2 + $0x19] sm:$0xff]  ;;  %448 = vst.msk [vmem:[#allocation2 + $0x60] sm:$0xff] %vm268_vm0, %v409_v36  ;;  %v339_v14 = vsel %vm309_vm2, %v337_v5, %v338_v6  ;;  %v343_v15 = vrot.slane %v258_v12, 7  ;;  %v431_v19 = vsel %vm309_vm2, %v338_v6, 0.0  ;;  %v344_v20 = vrot.slane %v259_v13, 7  ;;  %v261_v37 = vld [vmem:[%s2049_s7 + $0xc8] sm:$0xff] }
  0x26   : > { %635 = vrot.lane.b32.xlu1 %v525_v43, %s1952_s8  ;;  %447 = vst.msk [vmem:[#allocation2 + $0x58] sm:$0x3] %vm271_vm1, %v424_v41  ;;  %v415_v21 = vsel %vm309_vm2, 0.0, %v337_v5  ;;  %v340_v22 = vrot.slane %v256_v16, 7  ;;  %v341_v23 = vrot.slane %v257_v17, 7  ;;  %v430_v24 = vsel %vm309_vm2, %v335_v60, 0.0 }
  0x27   : > { %454 = vst.msk [vmem:[#allocation2 + $0x90] sm:$0xff] %vm268_vm0, %v411_v42  ;;  %v529_v51 = vld [vmem:[#allocation2 + $0x49] sm:$0xff]  ;;  %v417_v25 = vsel %vm309_vm2, 0.0, %v343_v15  ;;  %v345_v26 = vsel %vm309_vm2, %v343_v15, %v344_v20  ;;  %v433_v33 = vsel %vm309_vm2, %v344_v20, 0.0  ;;  %v260_v36 = vld [vmem:[%s2049_s7 + $0xc0] sm:$0xff]  ;;  %v347_v40 = vrot.slane %v261_v37, 7 }
  0x28   : > { %455 = vst.msk [vmem:[#allocation2 + $0x98] sm:$0xff] %vm268_vm0, %v327_v44  ;;  %v528_v55 = vld [vmem:[#allocation2 + $0x39] sm:$0xff]  ;;  %v342_v28 = vsel %vm309_vm2, %v340_v22, %v341_v23  ;;  %v432_v30 = vsel %vm309_vm2, %v341_v23, 0.0  ;;  %v416_v31 = vsel %vm309_vm2, 0.0, %v340_v22  ;;  %v346_v39 = vrot.slane %v260_v36, 7  ;;  %v262_v0 = vld [vmem:[%s2049_s7 + $0xd0] sm:$0xff] }
  0x29   : > { %452 = vst.msk [vmem:[#allocation2 + $0x80] sm:$0xff] %vm268_vm0, %v324_v47  ;;  %v526_v61 = vld [vmem:[#allocation2 + $0x21] sm:$0xff]  ;;  %v434_v46 = vsel %vm309_vm2, %v347_v40, 0.0  ;;  %v563_v53 = vld [vmem:[#allocation2 + $0x32] sm:$0xff] }
  0x2a   : > { %453 = vst.msk [vmem:[#allocation2 + $0x88] sm:$0x3] %vm271_vm1, %v426_v49  ;;  %v348_v41 = vsel %vm309_vm2, %v346_v39, %v347_v40  ;;  %v418_v42 = vsel %vm309_vm2, 0.0, %v346_v39  ;;  %v561_v54 = vld [vmem:[#allocation2 + $0x1a] sm:$0xff]  ;;  %v562_v57 = vld [vmem:[#allocation2 + $0x22] sm:$0xff] }
  0x2b   : > { %451 = vst.msk [vmem:[#allocation2 + $0x78] sm:$0xff] %vm268_vm0, %v410_v52  ;;  %v532_v8 = vld [vmem:[#allocation2 + $0x69] sm:$0xff]  ;;  %v2192_v1 = vld [vmem:[%s2049_s7 + $0xd8] sm:$0xff] }
  0x2c   : > { %641 = vrot.lane.b32.xlu2 %v528_v55, %s1952_s8  ;;  %458 = vst.msk [vmem:[#allocation2 + $0xb0] sm:$0xff] %vm268_vm0, %v330_v56  ;;  %v531_v10 = vld [vmem:[#allocation2 + $0x61] sm:$0xff]  ;;  %v568_v23 = vld [vmem:[#allocation2 + $0x6a] sm:$0xff] }
  0x2d   : > { %643 = vrot.lane.b32.xlu0 %v529_v51, %s1952_s8  ;;  %459 = vst.msk [vmem:[#allocation2 + $0xb8] sm:$0x3] %vm271_vm1, %v428_v58  ;;  %v530_v18 = vld [vmem:[#allocation2 + $0x51] sm:$0xff]  ;;  %v564_v56 = vld [vmem:[#allocation2 + $0x3a] sm:$0xff]  ;;  %v559_v17 = vld [vmem:[#allocation2 + $0x2] sm:$0xff] }
  0x2e   : > { %637 = vrot.lane.b32.xlu1 %v526_v61, %s1952_s8  ;;  %457 = vst.msk [vmem:[#allocation2 + $0xa8] sm:$0xff] %vm268_vm0, %v412_v59  ;;  %v565_v59 = vld [vmem:[#allocation2 + $0x4a] sm:$0xff]  ;;  %v566_v62 = vld [vmem:[#allocation2 + $0x52] sm:$0xff] }
  0x2f   : > { %456 = vst.msk [vmem:[#allocation2 + $0xa0] sm:$0x3] %vm271_vm1, %v427_v2  ;;  %v535_v27 = vld [vmem:[#allocation2 + $0x91] sm:$0xff] }
  0x30   : > { %463 = vst.msk [vmem:[#allocation2 + $0xd8] sm:$0xff] %vm268_vm0, %v414_v3  ;;  %v571_v2 = vld [vmem:[#allocation2 + $0x92] sm:$0xff]  ;;  %v349_v3 = vrot.slane %v262_v0, 7 }
  0x31   : > { %464 = vst.msk [vmem:[#allocation2 + $0xe0] sm:$0xff] %vm268_vm0, %v336_v4  ;;  %v534_v29 = vld [vmem:[#allocation2 + $0x81] sm:$0xff]  ;;  %v350_v4 = vrot.slane %v2192_v1, 7  ;;  %v492_v1 = vld [vmem:[#allocation2 + $0x38] sm:$0xff] }
  0x32   : > { %461 = vst.msk [vmem:[#allocation2 + $0xc8] sm:$0xff] %vm268_vm0, %v333_v7  ;;  %v533_v32 = vld [vmem:[#allocation2 + $0x79] sm:$0xff]  ;;  %v570_v63 = vld [vmem:[#allocation2 + $0x82] sm:$0xff]  ;;  %v419_v6 = vsel %vm309_vm2, 0.0, %v349_v3 }
  0x33   : > { %462 = vst.msk [vmem:[#allocation2 + $0xd0] sm:$0x3] %vm271_vm1, %v429_v9  ;;  %v569_v60 = vld [vmem:[#allocation2 + $0x7a] sm:$0xff]  ;;  %v351_v5 = vsel %vm309_vm2, %v349_v3, %v350_v4 }
  0x34   : > { %647 = vrot.lane.b32.xlu2 %v531_v10, %s1952_s8  ;;  %460 = vst.msk [vmem:[#allocation2 + $0xc0] sm:$0xff] %vm268_vm0, %v413_v11  ;;  %v538_v34 = vld [vmem:[#allocation2 + $0xb1] sm:$0xff] }
  0x35   : > { %649 = vrot.lane.b32.xlu0 %v532_v8, %s1952_s8  ;;  %467 = vst.msk [vmem:[#allocation2 + $0xf8] sm:$0xff] %vm268_vm0, %v339_v14  ;;  %v537_v35 = vld [vmem:[#allocation2 + $0xa9] sm:$0xff]  ;;  %v574_v22 = vld [vmem:[#allocation2 + $0xb2] sm:$0xff] }
  0x36   : > { %645 = vrot.lane.b32.xlu1 %v530_v18, %s1952_s8  ;;  %468 = vst.msk [vmem:[#allocation2 + $0x100] sm:$0x3] %vm271_vm1, %v431_v19  ;;  %v536_v38 = vld [vmem:[#allocation2 + $0x99] sm:$0xff]  ;;  %v573_v13 = vld [vmem:[#allocation2 + $0xaa] sm:$0xff]  ;;  %v567_v14 = vld [vmem:[#allocation2 + $0x62] sm:$0xff] }
  0x37   : > { %466 = vst.msk [vmem:[#allocation2 + $0xf0] sm:$0xff] %vm268_vm0, %v415_v21  ;;  %v572_v10 = vld [vmem:[#allocation2 + $0x9a] sm:$0xff] }
  0x38   : > { %465 = vst.msk [vmem:[#allocation2 + $0xe8] sm:$0x3] %vm271_vm1, %v430_v24  ;;  %v541_v43 = vld [vmem:[#allocation2 + $0xd9] sm:$0xff] }
  0x39   : > { %472 = vst.msk [vmem:[#allocation2 + $0x120] sm:$0xff] %vm268_vm0, %v417_v25  ;;  %v577_v9 = vld [vmem:[#allocation2 + $0xda] sm:$0xff] }
  0x3a   : > { %473 = vst.msk [vmem:[#allocation2 + $0x128] sm:$0xff] %vm268_vm0, %v345_v26  ;;  %v540_v44 = vld [vmem:[#allocation2 + $0xc9] sm:$0xff] }
  0x3b   : > { %470 = vst.msk [vmem:[#allocation2 + $0x110] sm:$0xff] %vm268_vm0, %v342_v28  ;;  %v539_v45 = vld [vmem:[#allocation2 + $0xc1] sm:$0xff] }
  0x3c   : > { %653 = vrot.lane.b32.xlu2 %v534_v29, %s1952_s8  ;;  %471 = vst.msk [vmem:[#allocation2 + $0x118] sm:$0x3] %vm271_vm1, %v432_v30  ;;  %v575_v37 = vld [vmem:[#allocation2 + $0xc2] sm:$0xff] }
  0x3d   : > { %655 = vrot.lane.b32.xlu0 %v535_v27, %s1952_s8  ;;  %469 = vst.msk [vmem:[#allocation2 + $0x108] sm:$0xff] %vm268_vm0, %v416_v31  ;;  %v544_v47 = vld [vmem:[#allocation2 + $0xf9] sm:$0xff] }
  0x3e   : > { %651 = vrot.lane.b32.xlu1 %v533_v32, %s1952_s8  ;;  %474 = vst.msk [vmem:[#allocation2 + $0x130] sm:$0x3] %vm271_vm1, %v433_v33  ;;  %v543_v48 = vld [vmem:[#allocation2 + $0xf1] sm:$0xff]  ;;  %v580_v18 = vld [vmem:[#allocation2 + $0xfa] sm:$0xff] }
  0x3f   : > { %475 = vst.msk [vmem:[#allocation2 + $0x138] sm:$0xff] %vm268_vm0, %v418_v42  ;;  %v542_v49 = vld [vmem:[#allocation2 + $0xe1] sm:$0xff]  ;;  %v579_v8 = vld [vmem:[#allocation2 + $0xf2] sm:$0xff]  ;;  %v560_v32 = vld [vmem:[#allocation2 + $0xa] sm:$0xff] }
  0x40   : > { %476 = vst.msk [vmem:[#allocation2 + $0x140] sm:$0xff] %vm268_vm0, %v348_v41  ;;  %v578_v12 = vld [vmem:[#allocation2 + $0xe2] sm:$0xff]  ;;  %v489_v41 = vld [vmem:[#allocation2 + $0x18] sm:$0xff] }
  0x41   : > { %477 = vst.msk [vmem:[#allocation2 + $0x148] sm:$0x3] %vm271_vm1, %v434_v46  ;;  %v547_v50 = vld [vmem:[#allocation2 + $0x121] sm:$0xff] }
  0x42   : > { %478 = vst.msk [vmem:[#allocation2 + $0x150] sm:$0xff] %vm268_vm0, %v419_v6 }
  0x43   : > { %v546_v51 = vld [vmem:[#allocation2 + $0x111] sm:$0xff]  ;;  %479 = vst.msk [vmem:[#allocation2 + $0x158] sm:$0xff] %vm268_vm0, %v351_v5 }
  0x44   : > { %659 = vrot.lane.b32.xlu2 %v537_v35, %s1952_s8  ;;  %v545_v52 = vld [vmem:[#allocation2 + $0x109] sm:$0xff] }
  0x45   : > { %661 = vrot.lane.b32.xlu0 %v538_v34, %s1952_s8  ;;  %v548_v55 = vld [vmem:[#allocation2 + $0x129] sm:$0xff] }
  0x46   : > { %657 = vrot.lane.b32.xlu1 %v536_v38, %s1952_s8 }
  0x47   : > { %v549_v58 = vld [vmem:[#allocation2 + $0x139] sm:$0xff] }
  0x48   : > { %v550_v61 = vld [vmem:[#allocation2 + $0x141] sm:$0xff] }
  0x49   : > { %v585_v27 = vld [vmem:[#allocation2 + $0x13a] sm:$0xff]  ;;  %v586_v42 = vld [vmem:[#allocation2 + $0x142] sm:$0xff] }
  0x4a   : > { %v551_v28 = vld [vmem:[#allocation2 + $0x151] sm:$0xff] }
  0x4b   : > { %v587_v33 = vld [vmem:[#allocation2 + $0x152] sm:$0xff] }
  0x4c   : > { %665 = vrot.lane.b32.xlu2 %v540_v44, %s1952_s8 }
  0x4d   : > { %667 = vrot.lane.b32.xlu0 %v541_v43, %s1952_s8 }
  0x4e   : > { %663 = vrot.lane.b32.xlu1 %v539_v45, %s1952_s8 }
  0x54   : > { %671 = vrot.lane.b32.xlu2 %v543_v48, %s1952_s8 }
  0x55   : > { %673 = vrot.lane.b32.xlu0 %v544_v47, %s1952_s8 }
  0x56   : > { %669 = vrot.lane.b32.xlu1 %v542_v49, %s1952_s8 }
  0x5c   : > { %677 = vrot.lane.b32.xlu2 %v546_v51, %s1952_s8 }
  0x5d   : > { %679 = vrot.lane.b32.xlu0 %v547_v50, %s1952_s8  ;;  %v435_v50 = vsel %vm309_vm2, %v350_v4, 0.0 }
  0x5e   : > { %675 = vrot.lane.b32.xlu1 %v545_v52, %s1952_s8  ;;  %480 = vst.msk [vmem:[#allocation2 + $0x160] sm:$0x3] %vm271_vm1, %v435_v50 }
  0x64   : > { %779 = vrot.lane.b32.xlu2 %v561_v54, %s1953_s9 }
  0x65   : > { %783 = vrot.lane.b32.xlu0 %v563_v53, %s1953_s9  ;;  %v491_v53 = vld [vmem:[#allocation2 + $0x30] sm:$0xff] }
  0x66   : > { %681 = vrot.lane.b32.xlu1 %v548_v55, %s1952_s8 }
  0x6c   : > { %781 = vrot.lane.b32.xlu2 %v562_v57, %s1953_s9  ;;  %v265_v57 = vld [vmem:[%s2049_s7 + $0xe8] sm:$0xff] }
  0x6d   : > { %785 = vrot.lane.b32.xlu0 %v564_v56, %s1953_s9  ;;  %v264_v56 = vld [vmem:[%s2049_s7 + $0xe0] sm:$0xff] }
  0x6e   : > { %683 = vrot.lane.b32.xlu1 %v549_v58, %s1952_s8 }
  0x74   : > { %795 = vrot.lane.b32.xlu2 %v569_v60, %s1953_s9  ;;  %v353_v60 = vrot.slane %v265_v57, 7 }
  0x75   : > { %787 = vrot.lane.b32.xlu0 %v565_v59, %s1953_s9  ;;  %v352_v59 = vrot.slane %v264_v56, 7 }
  0x76   : > { %685 = vrot.lane.b32.xlu1 %v550_v61, %s1952_s8 }
  0x77   : > { %v420_v0 = vsel %vm309_vm2, 0.0, %v352_v59 }
  0x78   : > { %481 = vst.msk [vmem:[#allocation2 + $0x168] sm:$0xff] %vm268_vm0, %v420_v0 }
  0x7c   : > { %797 = vrot.lane.b32.xlu2 %v570_v63, %s1953_s9  ;;  %v436_v63 = vsel %vm309_vm2, %v353_v60, 0.0 }
  0x7d   : > { %789 = vrot.lane.b32.xlu0 %v566_v62, %s1953_s9  ;;  %v354_v62 = vsel %vm309_vm2, %v352_v59, %v353_v60  ;;  %483 = vst.msk [vmem:[#allocation2 + $0x178] sm:$0x3] %vm271_vm1, %v436_v63  ;;  %v576_v60 = vld [vmem:[#allocation2 + $0xca] sm:$0xff] }
  0x7e   : > { %799 = vrot.lane.b32.xlu1 %v571_v2, %s1953_s9  ;;  %v2202_v7 = vpop.permute.xlu2 %639  ;;  %482 = vst.msk [vmem:[#allocation2 + $0x170] sm:$0xff] %vm268_vm0, %v354_v62  ;;  %v581_v2 = vld [vmem:[#allocation2 + $0x10a] sm:$0xff] }
  0x7f   : > { %v887_v54 = vsel %vm268_vm0, %v491_v53, %v2202_v7 }
  0x84   : > { %811 = vrot.lane.b32.xlu2 %v577_v9, %s1953_s9  ;;  %v490_v9 = vld [vmem:[#allocation2 + $0x20] sm:$0xff] }
  0x85   : > { %815 = vrot.lane.b32.xlu0 %v579_v8, %s1953_s9  ;;  %v493_v8 = vld [vmem:[#allocation2 + $0x48] sm:$0xff]  ;;  %v554_v59 = vld [vmem:[#allocation2 + $0x171] sm:$0xff] }
  0x86   : > { %801 = vrot.lane.b32.xlu1 %v572_v10, %s1953_s9  ;;  %v2209_v11 = vpop.permute.xlu2 %641  ;;  %v582_v10 = vld [vmem:[#allocation2 + $0x112] sm:$0xff] }
  0x87   : > { %v888_v3 = vsel %vm268_vm0, %v492_v1, %v2209_v11  ;;  %v590_v1 = vld [vmem:[#allocation2 + $0x172] sm:$0xff] }
  0x8c   : > { %803 = vrot.lane.b32.xlu2 %v573_v13, %s1953_s9 }
  0x8d   : > { %813 = vrot.lane.b32.xlu0 %v578_v12, %s1953_s9 }
  0x8e   : > { %791 = vrot.lane.b32.xlu1 %v567_v14, %s1953_s9  ;;  %v2216_v16 = vpop.permute.xlu2 %647 }
  0x8f   : > { %v2213_v15 = vpop.permute.xlu0 %631 }
  0x94   : > { %775 = vrot.lane.b32.xlu2 %v559_v17, %s1953_s9 }
  0x96   : > { %817 = vrot.lane.b32.xlu1 %v580_v18, %s1953_s9  ;;  %v2222_v20 = vpop.permute.xlu2 %653 }
  0x97   : > { %v2219_v19 = vpop.permute.xlu0 %633 }
  0x98   : > { %v636_v21 = vpop.permute.xlu1 %635 }
  0x99   : > { %v885_v44 = vsel %vm268_vm0, %v489_v41, %v636_v21 }
  0x9c   : > { %805 = vrot.lane.b32.xlu2 %v574_v22, %s1953_s9  ;;  %v497_v22 = vld [vmem:[#allocation2 + $0x78] sm:$0xff] }
  0x9e   : > { %793 = vrot.lane.b32.xlu1 %v568_v23, %s1953_s9  ;;  %v2228_v25 = vpop.permute.xlu2 %659  ;;  %v583_v23 = vld [vmem:[#allocation2 + $0x122] sm:$0xff] }
  0x9f   : > { %v2225_v24 = vpop.permute.xlu0 %643 }
  0xa0   : > { %v2230_v26 = vpop.permute.xlu1 %637  ;;  %v889_v11 = vsel %vm268_vm0, %v493_v8, %v2225_v24  ;;  %v505_v8 = vld [vmem:[#allocation2 + $0xd8] sm:$0xff] }
  0xa1   : > { %v886_v13 = vsel %vm268_vm0, %v490_v9, %v2230_v26  ;;  %v552_v26 = vld [vmem:[#allocation2 + $0x159] sm:$0xff] }
  0xa4   : > { %827 = vrot.lane.b32.xlu2 %v585_v27, %s1953_s9  ;;  %v266_v27 = vld [vmem:[%s2049_s7 + $0xf0] sm:$0xff] }
  0xa6   : > { %687 = vrot.lane.b32.xlu1 %v551_v28, %s1952_s8  ;;  %v2236_v30 = vpop.permute.xlu2 %665  ;;  %v2328_v28 = vld [vmem:[%s2049_s7 + $0xf8] sm:$0xff] }
  0xa7   : > { %v2233_v29 = vpop.permute.xlu0 %649 }
  0xa8   : > { %v2238_v31 = vpop.permute.xlu1 %645 }
  0xac   : > { %777 = vrot.lane.b32.xlu2 %v560_v32, %s1953_s9 }
  0xae   : > { %831 = vrot.lane.b32.xlu1 %v587_v33, %s1953_s9  ;;  %v2244_v35 = vpop.permute.xlu2 %671  ;;  %v355_v33 = vrot.slane %v266_v27, 7 }
  0xaf   : > { %v2241_v34 = vpop.permute.xlu0 %655 }
  0xb0   : > { %v2246_v36 = vpop.permute.xlu1 %651  ;;  %v421_v41 = vsel %vm309_vm2, 0.0, %v355_v33 }
  0xb1   : > { %v893_v24 = vsel %vm268_vm0, %v497_v22, %v2246_v36  ;;  %484 = vst.msk [vmem:[#allocation2 + $0x180] sm:$0xff] %vm268_vm0, %v421_v41 }
  0xb6   : > { %807 = vrot.lane.b32.xlu1 %v575_v37, %s1953_s9  ;;  %v2251_v39 = vpop.permute.xlu2 %677  ;;  %v356_v37 = vrot.slane %v2328_v28, 7  ;;  %v1250_v28 = vld [vmem:[%s2974_s1 + $0x10] sm:$0xff] }
  0xb7   : > { %v2248_v38 = vpop.permute.xlu0 %661 }
  0xb8   : > { %v2253_v40 = vpop.permute.xlu1 %657  ;;  %v357_v36 = vsel %vm309_vm2, %v355_v33, %v356_v37  ;;  %v495_v33 = vld [vmem:[#allocation2 + $0x60] sm:$0xff] }
  0xb9   : > { %485 = vst.msk [vmem:[#allocation2 + $0x188] sm:$0xff] %vm268_vm0, %v357_v36 }
  0xbe   : > { %829 = vrot.lane.b32.xlu1 %v586_v42, %s1953_s9  ;;  %v780_v45 = vpop.permute.xlu2 %779  ;;  %v498_v42 = vld [vmem:[#allocation2 + $0x80] sm:$0xff] }
  0xbf   : > { %v2255_v43 = vpop.permute.xlu0 %667  ;;  %v2260_v46 = vsel %vm919_vm3, %v885_v44, %v780_v45  ;;  %v499_v44 = vld [vmem:[#allocation2 + $0x90] sm:$0xff]  ;;  %v894_v53 = vsel %vm268_vm0, %v498_v42, %v2222_v20 }
  0xc0   : > { %v2262_v47 = vpop.permute.xlu1 %663  ;;  %988 = vrot.lane.b32.xlu0 %v2260_v46, %s1954_s10  ;;  %v589_v20 = vld [vmem:[#allocation2 + $0x16a] sm:$0xff]  ;;  %v555_v22 = vld [vmem:[#allocation2 + $0x181] sm:$0xff] }
  0xc1   : > { %v584_v42 = vld [vmem:[#allocation2 + $0x12a] sm:$0xff] }
  0xc6   : > { %v782_v6 = vpop.permute.xlu2 %781 }
  0xc7   : > { %v2266_v48 = vpop.permute.xlu0 %673  ;;  %v2318_v17 = vsel %vm919_vm3, %v886_v13, %v782_v6 }
  0xc8   : > { %v2268_v49 = vpop.permute.xlu1 %669 }
  0xce   : > { %v796_v18 = vpop.permute.xlu2 %795 }
  0xcf   : > { %v2274_v51 = vpop.permute.xlu0 %679  ;;  %v2331_v32 = vsel %vm919_vm3, %v893_v24, %v796_v18 }
  0xd0   : > { %v2276_v52 = vpop.permute.xlu1 %675 }
  0xd6   : > { %v798_v45 = vpop.permute.xlu2 %797 }
  0xd7   : > { %v784_v55 = vpop.permute.xlu0 %783  ;;  %v2349_v56 = vsel %vm919_vm3, %v894_v53, %v798_v45  ;;  %v1251_v53 = vld [vmem:[%s2974_s1 + $0x18] sm:$0xff] }
  0xd8   : > { %v2283_v58 = vsel %vm919_vm3, %v887_v54, %v784_v55  ;;  %v2289_v61 = vpop.permute.xlu1 %681  ;;  %v895_v54 = vsel %vm268_vm0, %v499_v44, %v2241_v34  ;;  %v588_v55 = vld [vmem:[#allocation2 + $0x15a] sm:$0xff]  ;;  %v494_v34 = vld [vmem:[#allocation2 + $0x50] sm:$0xff] }
  0xd9   : > { %992 = vrot.lane.b32.xlu1 %v2283_v58, %s1954_s10  ;;  %1086 = vrot.lane.b32.xlu0 %v2283_v58, %s1955_s11 }
  0xde   : > { %v812_v62 = vpop.permute.xlu2 %811 }
  0xdf   : > { %v786_v4 = vpop.permute.xlu0 %785 }
  0xe0   : > { %v2300_v5 = vsel %vm919_vm3, %v888_v3, %v786_v4  ;;  %v2305_v7 = vpop.permute.xlu1 %683  ;;  %v553_v3 = vld [vmem:[#allocation2 + $0x169] sm:$0xff] }
  0xe1   : > { %1088 = vrot.lane.b32.xlu2 %v2300_v5, %s1955_s11  ;;  %819 = vrot.lane.b32.xlu0 %v581_v2, %s1953_s9  ;;  %v890_v2 = vsel %vm268_vm0, %v494_v34, %v2238_v31 }
  0xe6   : > { %v2371_v6 = vpop.permute.xlu2 %803 }
  0xe7   : > { %v788_v12 = vpop.permute.xlu0 %787 }
  0xe8   : > { %v2312_v14 = vsel %vm919_vm3, %v889_v11, %v788_v12  ;;  %v2322_v21 = vpop.permute.xlu1 %685  ;;  %v507_v11 = vld [vmem:[#allocation2 + $0xf0] sm:$0xff]  ;;  %v500_v12 = vld [vmem:[#allocation2 + $0x98] sm:$0xff] }
  0xe9   : > { %821 = vrot.lane.b32.xlu2 %v582_v10, %s1953_s9  ;;  %1090 = vrot.lane.b32.xlu1 %v2312_v14, %s1955_s11  ;;  %v901_v10 = vsel %vm268_vm0, %v505_v8, %v2255_v43  ;;  %v903_v43 = vsel %vm268_vm0, %v507_v11, %v2244_v35  ;;  %v508_v35 = vld [vmem:[#allocation2 + $0xf8] sm:$0xff]  ;;  %v502_v8 = vld [vmem:[#allocation2 + $0xb0] sm:$0xff] }
  0xea   : > { %990 = vrot.lane.b32.xlu0 %v2318_v17, %s1954_s10  ;;  %v2376_v31 = vsel %vm919_vm3, %v901_v10, %v812_v62  ;;  %v904_v36 = vsel %vm268_vm0, %v508_v35, %v2266_v48  ;;  %v1252_v48 = vld [vmem:[%s2974_s1 + $0x20] sm:$0xf] }
  0xeb   : > { %1789 = vmatpush.msk.msra.mxu0 %vm1350_vm4, %v1252_v48  ;;  %1828 = vmatpush.msk.msra.mxu1 %vm1350_vm4, %v1252_v48  ;;  %v591_v10 = vld [vmem:[#allocation2 + $0x182] sm:$0xff] }
  0xec   : > { %1829 = vmatpush.msk.msra.mxu2 %vm1350_vm4, %v1252_v48  ;;  %1830 = vmatpush.msk.msra.mxu3 %vm1350_vm4, %v1252_v48  ;;  %v487_v35 = vld [vmem:[#allocation2] sm:$0xff] }
  0xed   : > { %1366 = vmatpush.msra.mxu0 %v1251_v53  ;;  %1831 = vmatpush.msra.mxu1 %v1251_v53 }
  0xee   : > { %v2384_v13 = vpop.permute.xlu2 %775  ;;  %1832 = vmatpush.msra.mxu2 %v1251_v53  ;;  %1833 = vmatpush.msra.mxu3 %v1251_v53 }
  0xef   : > { %v790_v0 = vpop.permute.xlu0 %789  ;;  %1367 = vmatpush.msra.mxu0 %v1250_v28  ;;  %1834 = vmatpush.msra.mxu1 %v1250_v28 }
  0xf0   : > { %v800_v50 = vpop.permute.xlu1 %799  ;;  %v2365_v4 = vsel %vm919_vm3, %v890_v2, %v790_v0  ;;  %1835 = vmatpush.msra.mxu2 %v1250_v28  ;;  %1836 = vmatpush.msra.mxu3 %v1250_v28  ;;  %v1248_v0 = vld [vmem:[%s2974_s1] sm:$0xff] }
  0xf1   : > { %823 = vrot.lane.b32.xlu1 %v583_v23, %s1953_s9  ;;  %1004 = vrot.lane.b32.xlu2 %v2331_v32, %s1954_s10  ;;  %v2352_v57 = vsel %vm919_vm3, %v895_v54, %v800_v50  ;;  %v896_v23 = vsel %vm268_vm0, %v500_v12, %v2253_v40  ;;  %v891_v40 = vsel %vm268_vm0, %v495_v33, %v2216_v16  ;;  %v437_v16 = vsel %vm309_vm2, %v356_v37, 0.0  ;;  %v496_v54 = vld [vmem:[#allocation2 + $0x68] sm:$0xff]  ;;  %v513_v12 = vld [vmem:[#allocation2 + $0x138] sm:$0xff] }
  0xf2   : > { %689 = vrot.lane.b32.xlu0 %v552_v26, %s1952_s8  ;;  %486 = vst.msk [vmem:[#allocation2 + $0x190] sm:$0x3] %vm271_vm1, %v437_v16  ;;  %v892_v37 = vsel %vm268_vm0, %v496_v54, %v2233_v29  ;;  %v1249_v29 = vld [vmem:[%s2974_s1 + $0x8] sm:$0xff] }
  0xf3   : > { %1368 = vmatpush.msra.mxu0 %v1249_v29  ;;  %1837 = vmatpush.msra.mxu1 %v1249_v29  ;;  %v509_v54 = vld [vmem:[#allocation2 + $0x108] sm:$0xff] }
  0xf4   : > { %1838 = vmatpush.msra.mxu2 %v1249_v29  ;;  %1839 = vmatpush.msra.mxu3 %v1249_v29  ;;  %v488_v29 = vld [vmem:[#allocation2 + $0x8] sm:$0xff] }
  0xf5   : > { %1369 = vmatpush.msra.mxu0 %v1248_v0  ;;  %1840 = vmatpush.msra.mxu1 %v1248_v0 }
  0xf6   : > { %v806_v41 = vpop.permute.xlu2 %805  ;;  %1841 = vmatpush.msra.mxu2 %v1248_v0  ;;  %1842 = vmatpush.msra.mxu3 %v1248_v0  ;;  %v510_v0 = vld [vmem:[#allocation2 + $0x110] sm:$0xff] }
  0xf7   : > { %v816_v18 = vpop.permute.xlu0 %815 }
  0xf8   : > { %v802_v63 = vpop.permute.xlu1 %801  ;;  %v2391_v26 = vsel %vm919_vm3, %v903_v43, %v816_v18  ;;  %v909_v18 = vsel %vm268_vm0, %v513_v12, %v2305_v7 }
  0xf9   : > { %1006 = vrot.lane.b32.xlu1 %v2349_v56, %s1954_s10  ;;  %1102 = vrot.lane.b32.xlu2 %v2352_v57, %s1955_s11  ;;  %v2397_v27 = vsel %vm919_vm3, %v896_v23, %v802_v63  ;;  %v501_v63 = vld [vmem:[#allocation2 + $0xa8] sm:$0xff] }
  0xfa   : > { %833 = vrot.lane.b32.xlu0 %v588_v55, %s1953_s9  ;;  %v506_v55 = vld [vmem:[#allocation2 + $0xe0] sm:$0xff]  ;;  %v556_v7 = vld [vmem:[#allocation2 + $0x189] sm:$0xff] }
  0xfe   : > { %v828_v34 = vpop.permute.xlu2 %827 }
  0xff   : > { %v2474_v23 = vsel %vm919_vm3, %v909_v18, %v828_v34  ;;  %v557_v18 = vld [vmem:[#allocation2 + $0x199] sm:$0xff] }
 0x100   : > { %v792_v9 = vpop.permute.xlu1 %791 }
 0x101   : > { %693 = vrot.lane.b32.xlu1 %v554_v59, %s1952_s8  ;;  %835 = vrot.lane.b32.xlu2 %v589_v20, %s1953_s9  ;;  %v2406_v44 = vsel %vm919_vm3, %v891_v40, %v792_v9  ;;  %v814_v59 = vpop.permute.xlu0 %813  ;;  %v902_v20 = vsel %vm268_vm0, %v506_v55, %v2268_v49 }
 0x102   : > { %809 = vrot.lane.b32.xlu0 %v576_v60, %s1953_s9  ;;  %v2434_v60 = vsel %vm919_vm3, %v902_v20, %v814_v59 }
 0x108   : > { %v818_v24 = vpop.permute.xlu1 %817 }
 0x109   : > { %837 = vrot.lane.b32.xlu1 %v590_v1, %s1953_s9  ;;  %1092 = vrot.lane.b32.xlu2 %v2365_v4, %s1955_s11  ;;  %v2409_v45 = vsel %vm919_vm3, %v904_v36, %v818_v24  ;;  %v897_v1 = vsel %vm268_vm0, %v501_v63, %v2228_v25  ;;  %v898_v25 = vsel %vm268_vm0, %v502_v8, %v2248_v38 }
 0x10a   : > { %691 = vrot.lane.b32.xlu0 %v553_v3, %s1952_s8  ;;  %v2459_v2 = vsel %vm919_vm3, %v897_v1, %v2371_v6  ;;  %v778_v3 = vpop.permute.xlu2 %777  ;;  %v2466_v11 = vsel %vm919_vm3, %v898_v25, %v806_v41  ;;  %v883_v36 = vsel %vm268_vm0, %v487_v35, %v2213_v15  ;;  %v592_v15 = vld [vmem:[#allocation2 + $0x18a] sm:$0xff] }
 0x10b   : > { %v920_v41 = vsel %vm919_vm3, %v883_v36, %v2384_v13  ;;  %v905_v13 = vsel %vm268_vm0, %v509_v54, %v2276_v52  ;;  %v884_v52 = vsel %vm268_vm0, %v488_v29, %v2219_v19 }
 0x10c   : > { %v921_v1 = vsel %vm919_vm3, %v884_v52, %v778_v3 }
 0x110   : > { %v794_v50 = vpop.permute.xlu1 %793 }
 0x111   : > { %1008 = vrot.lane.b32.xlu1 %v2352_v57, %s1954_s10  ;;  %1020 = vrot.lane.b32.xlu2 %v2376_v31, %s1954_s10  ;;  %v2437_v62 = vsel %vm919_vm3, %v892_v37, %v794_v50 }
 0x112   : > { %994 = vrot.lane.b32.xlu0 %v2300_v5, %s1954_s10 }
 0x118   : > { %v688_v49 = vpop.permute.xlu1 %687 }
 0x119   : > { %695 = vrot.lane.b32.xlu1 %v555_v22, %s1952_s8  ;;  %1118 = vrot.lane.b32.xlu2 %v2391_v26, %s1955_s11  ;;  %v515_v22 = vld [vmem:[#allocation2 + $0x150] sm:$0xff] }
 0x11a   : > { %1104 = vrot.lane.b32.xlu0 %v2397_v27, %s1955_s11  ;;  %v911_v38 = vsel %vm268_vm0, %v515_v22, %v688_v49 }
 0x120   : > { %v832_v9 = vpop.permute.xlu1 %831 }
 0x121   : > { %1094 = vrot.lane.b32.xlu2 %v2406_v44, %s1955_s11  ;;  %1120 = vrot.lane.b32.xlu1 %v2409_v45, %s1955_s11  ;;  %v2482_v40 = vsel %vm919_vm3, %v911_v38, %v832_v9  ;;  %v503_v9 = vld [vmem:[#allocation2 + $0xc0] sm:$0xff] }
 0x122   : > { %825 = vrot.lane.b32.xlu0 %v584_v42, %s1953_s9  ;;  %v899_v19 = vsel %vm268_vm0, %v503_v9, %v2262_v47 }
 0x128   : > { %v808_v43 = vpop.permute.xlu1 %807 }
 0x129   : > { %1022 = vrot.lane.b32.xlu2 %v2434_v60, %s1954_s10  ;;  %1096 = vrot.lane.b32.xlu1 %v2437_v62, %s1955_s11  ;;  %v936_v3 = vsel %vm919_vm3, %v899_v19, %v808_v43  ;;  %v516_v43 = vld [vmem:[#allocation2 + $0x158] sm:$0xff] }
 0x12a   : > { %996 = vrot.lane.b32.xlu0 %v2312_v14, %s1954_s10 }
 0x130   : > { %v830_v42 = vpop.permute.xlu1 %829 }
 0x131   : > { %998 = vrot.lane.b32.xlu2 %v2365_v4, %s1954_s10  ;;  %1024 = vrot.lane.b32.xlu1 %v2391_v26, %s1954_s10 }
 0x132   : > { %1106 = vrot.lane.b32.xlu0 %v2459_v2, %s1955_s11  ;;  %v989_v24 = vpop.permute.xlu0 %988 }
 0x133   : > { %v1183_v50 = vsel %vm1182_vm5, %v920_v41, %v989_v24 }
 0x139   : > { %1108 = vrot.lane.b32.xlu2 %v2466_v11, %s1955_s11 }
 0x13a   : > { %839 = vrot.lane.b32.xlu0 %v591_v10, %s1953_s9 }
 0x13b   : > { %v1089_v6 = vpop.permute.xlu2 %1088 }
 0x141   : > { %1036 = vrot.lane.b32.xlu2 %v2474_v23, %s1954_s10 }
 0x142   : > { %1010 = vrot.lane.b32.xlu0 %v2397_v27, %s1954_s10 }
 0x143   : > { %v822_v33 = vpop.permute.xlu2 %821 }
 0x149   : > { %1134 = vrot.lane.b32.xlu2 %v2482_v40, %s1955_s11 }
 0x14a   : > { %697 = vrot.lane.b32.xlu0 %v556_v7, %s1952_s8 }
 0x14b   : > { %v1087_v16 = vpop.permute.xlu0 %1086  ;;  %v1005_v48 = vpop.permute.xlu2 %1004 }
 0x14c   : > { %v1216_v53 = vsel %vm1215_vm6, %v1183_v50, %v1087_v16  ;;  %v993_v55 = vpop.permute.xlu1 %992  ;;  %v1191_v59 = vsel %vm1182_vm5, %v2406_v44, %v1005_v48  ;;  %v558_v16 = vld [vmem:[#allocation2 + $0x1a1] sm:$0xff] }
 0x14d   : > { %1790 = vmatmul.msk.f32.vlgmr.msra.gmra.mxu0 %vm1253_vm7, %v1216_v53  ;;  %v1185_v24 = vsel %vm1182_vm5, %v2260_v46, %v993_v55  ;;  %v593_v46 = vld [vmem:[#allocation2 + $0x19a] sm:$0xff]  ;;  %v594_v55 = vld [vmem:[#allocation2 + $0x1a2] sm:$0xff] }
 0x151   : > { %1098 = vrot.lane.b32.xlu2 %v2331_v32, %s1955_s11 }
 0x152   : > { %841 = vrot.lane.b32.xlu0 %v592_v15, %s1953_s9 }
 0x153   : > { %v820_v28 = vpop.permute.xlu0 %819  ;;  %v1103_v37 = vpop.permute.xlu2 %1102 }
 0x154   : > { %v1224_v20 = vsel %vm1215_vm6, %v1191_v59, %v1103_v37  ;;  %v2503_v34 = vsel %vm919_vm3, %v905_v13, %v820_v28  ;;  %v504_v13 = vld [vmem:[#allocation2 + $0xc8] sm:$0xff] }
 0x155   : > { %1798 = vmatmul.msk.f32.vlgmr.msra.gmra.mxu1 %vm1253_vm7, %v1224_v20  ;;  %1122 = vrot.lane.b32.xlu1 %v2503_v34, %s1955_s11  ;;  %v900_v59 = vsel %vm268_vm0, %v504_v13, %v2236_v30  ;;  %v517_v30 = vld [vmem:[#allocation2 + $0x168] sm:$0xff] }
 0x159   : > { %1026 = vrot.lane.b32.xlu2 %v2409_v45, %s1954_s10 }
 0x15a   : > { %1000 = vrot.lane.b32.xlu0 %v2406_v44, %s1954_s10  ;;  %v906_v44 = vsel %vm268_vm0, %v510_v0, %v2251_v39  ;;  %v514_v39 = vld [vmem:[#allocation2 + $0x140] sm:$0xff] }
 0x15b   : > { %v2514_v49 = vpop.permute.xlu2 %835  ;;  %v1091_v63 = vpop.permute.xlu1 %1090  ;;  %v2527_v12 = vsel %vm919_vm3, %v906_v44, %v822_v33  ;;  %v910_v33 = vsel %vm268_vm0, %v514_v39, %v2322_v21 }
 0x15c   : > { %v991_v8 = vpop.permute.xlu0 %990  ;;  %v1218_v47 = vsel %vm1215_vm6, %v1185_v24, %v1091_v63  ;;  %v2543_v35 = vsel %vm919_vm3, %v910_v33, %v830_v42  ;;  %v512_v24 = vld [vmem:[#allocation2 + $0x128] sm:$0xff] }
 0x15d   : > { %v1184_v25 = vsel %vm1182_vm5, %v921_v1, %v991_v8  ;;  %1012 = vrot.lane.b32.xlu1 %v2459_v2, %s1954_s10  ;;  %v511_v1 = vld [vmem:[#allocation2 + $0x120] sm:$0xff]  ;;  %v908_v33 = vsel %vm268_vm0, %v512_v24, %v2289_v61 }
 0x15e   : > { %v1217_v10 = vsel %vm1215_vm6, %v1184_v25, %v1089_v6  ;;  %v907_v25 = vsel %vm268_vm0, %v511_v1, %v2274_v51 }
 0x15f   : > { %1791 = vmatmul.msk.f32.gmra.mxu0 %vm1253_vm7, %v1217_v10 }
 0x161   : > { %1124 = vrot.lane.b32.xlu2 %v2527_v12, %s1955_s11 }
 0x162   : > { %1110 = vrot.lane.b32.xlu0 %v936_v3, %s1955_s11 }
 0x163   : > { %v1093_v6 = vpop.permute.xlu2 %1092  ;;  %v824_v22 = vpop.permute.xlu1 %823 }
 0x164   : > { %v690_v38 = vpop.permute.xlu0 %689  ;;  %v944_v44 = vsel %vm919_vm3, %v907_v25, %v824_v22 }
 0x165   : > { %699 = vrot.lane.b32.xlu1 %v557_v18, %s1952_s8  ;;  %v912_v41 = vsel %vm268_vm0, %v516_v43, %v690_v38 }
 0x167   : > { %1792 = vmatmul.msk.f32.gmra.mxu0 %vm1253_vm7, %v1218_v47  ;;  %v518_v47 = vld [vmem:[#allocation2 + $0x170] sm:$0xff] }
 0x169   : > { %1014 = vrot.lane.b32.xlu2 %v2466_v11, %s1954_s10 }
 0x16a   : > { %1038 = vrot.lane.b32.xlu0 %v2543_v35, %s1954_s10 }
 0x16b   : > { %v1021_v7 = vpop.permute.xlu2 %1020  ;;  %v1007_v36 = vpop.permute.xlu1 %1006 }
 0x16c   : > { %v834_v50 = vpop.permute.xlu0 %833  ;;  %v1199_v42 = vsel %vm1182_vm5, %v936_v3, %v1021_v7 }
 0x16d   : > { %843 = vrot.lane.b32.xlu1 %v593_v46, %s1953_s9  ;;  %v2550_v21 = vsel %vm919_vm3, %v912_v41, %v834_v50 }
 0x171   : > { %701 = vrot.lane.b32.xlu2 %v558_v16, %s1952_s8  ;;  %s2663_s8 = scalar_lea.vmem %s2977_s4, %s1826_s29  ;;  %s1784_s29 = sshll.u32 %s223_s28, 1 }
 0x172   : > { %1136 = vrot.lane.b32.xlu0 %v2550_v21, %s1955_s11  ;;  %s225_s13 = scalar_lea.vmem [#allocation3], %s1784_s29 }
 0x173   : > { %v1119_v48 = vpop.permute.xlu2 %1118  ;;  %v694_v53 = vpop.permute.xlu1 %693  ;;  %s1693_s14 = sshll.u32 %s225_s13, 4  ;;  %s1694_s14 = int_to_ptr.vmem [resolvable:$true] %s1693_s14 }
 0x174   : > { %v810_v15 = vpop.permute.xlu0 %809  ;;  %v1232_v54 = vsel %vm1215_vm6, %v1199_v42, %v1119_v48  ;;  %v914_v43 = vsel %vm268_vm0, %v518_v47, %v694_v53 }
 0x175   : > { %1002 = vrot.lane.b32.xlu1 %v2437_v62, %s1954_s10  ;;  %1806 = vmatmul.msk.f32.vlgmr.msra.gmra.mxu2 %vm1253_vm7, %v1232_v54  ;;  %v937_v29 = vsel %vm919_vm3, %v900_v59, %v810_v15  ;;  %v519_v59 = vld [vmem:[#allocation2 + $0x180] sm:$0xff] }
 0x179   : > { %845 = vrot.lane.b32.xlu2 %v594_v55, %s1953_s9  ;;  %s1823_s9 = sshll.u32 %s2007_s2, 1  ;;  %s1678_s2 = scalar_lea.sflag [#allocation4], %s223_s28 }
 0x17a   : > { %1100 = vrot.lane.b32.xlu0 %v2349_v56, %s1955_s11  ;;  %s1691_s12 = scalar_lea.hbm %s2978_s5, %s1823_s9 }
 0x17b   : > { %v1095_v28 = vpop.permute.xlu2 %1094  ;;  %v838_v37 = vpop.permute.xlu1 %837  ;;  %s1695_s15 = sshll.u32 %s1691_s12, 4  ;;  %s1696_s15 = int_to_ptr.hbm [resolvable:$true] %s1695_s15 }
 0x17c   : > { %v692_v20 = vpop.permute.xlu0 %691  ;;  %v2612_v41 = vsel %vm919_vm3, %v914_v43, %v838_v37  ;;  %s1901_s16 = sshra.s32 %s1696_s15, 4  ;;  %s1902_s16 = int_to_ptr.hbm [resolvable:$true] %s1901_s16 }
 0x17d   : > { %1112 = vrot.lane.b32.xlu1 %v937_v29, %s1955_s11  ;;  %v913_v10 = vsel %vm268_vm0, %v517_v30, %v692_v20  ;;  %v520_v30 = vld [vmem:[#allocation2 + $0x188] sm:$0xff]  ;;  %s1903_s17 = scalar_lea.hbm %s1902_s16, 2  ;;  %p1908_p0 = scmp.lt.s32.totalorder %s1902_s16, %s2978_s5 }
 0x17e   : > { %p1904_p11 = scmp.ne.s32.totalorder %s1902_s16, %s1903_s17  ;;  %p1909_p1 = scmp.lt.s32.totalorder %s1907_s24, %s1903_s17 }
 0x180   : > { %p1905_p12 = pnand %p1904_p11, %p2024_p5  ;;  %p1910_p2 = por %p1909_p1, %p1908_p0 }
 0x181   : > { %1016 = vrot.lane.b32.xlu2 %v936_v3, %s1954_s10  ;;  %v1192_v3 = vsel %vm1182_vm5, %v2437_v62, %v1007_v36 }
 0x182   : > { %1028 = vrot.lane.b32.xlu0 %v2503_v34, %s1954_s10  ;;  %p1906_p13 = pneg %p1905_p12 }
 0x183   : > { %v1023_v52 = vpop.permute.xlu2 %1022  ;;  %v1009_v63 = vpop.permute.xlu1 %1008 }
 0x184   : > { %v995_v0 = vpop.permute.xlu0 %994  ;;  %v1200_v22 = vsel %vm1182_vm5, %v937_v29, %v1023_v52  ;;  %p1911_p3 = pnand %p1910_p2, %p1906_p13 }
 0x185   : > { %v1186_v8 = vsel %vm1182_vm5, %v2318_v17, %v995_v0  ;;  %1040 = vrot.lane.b32.xlu1 %v2482_v40, %s1954_s10 }
 0x186   : > { %v1219_v9 = vsel %vm1215_vm6, %v1186_v8, %v1093_v6  ;;  %v2587_v6 = vsel %vm919_vm3, %v913_v10, %v2514_v49 }
 0x187   : > { %1793 = vmatmul.msk.f32.gmra.mxu0 %vm1253_vm7, %v1219_v9 }
 0x189   : > { %1042 = vrot.lane.b32.xlu2 %v2550_v21, %s1954_s10 }
 0x18a   : > { %1126 = vrot.lane.b32.xlu0 %v944_v44, %s1955_s11 }
 0x18b   : > { %v999_v17 = vpop.permute.xlu2 %998  ;;  %v696_v19 = vpop.permute.xlu1 %695 }
 0x18c   : > { %v1105_v18 = vpop.permute.xlu0 %1104  ;;  %v1188_v54 = vsel %vm1182_vm5, %v2300_v5, %v999_v17 }
 0x18d   : > { %1138 = vrot.lane.b32.xlu1 %v2587_v6, %s1955_s11  ;;  %v1225_v51 = vsel %vm1215_vm6, %v1192_v3, %v1105_v18 }
 0x18e   : > { %1799 = vmatmul.msk.f32.gmra.mxu1 %vm1253_vm7, %v1225_v51 }
 0x191   : > { %1018 = vrot.lane.b32.xlu2 %v937_v29, %s1954_s10 }
 0x192   : > { %1114 = vrot.lane.b32.xlu0 %v2376_v31, %s1955_s11 }
 0x193   : > { %v1109_v62 = vpop.permute.xlu2 %1108  ;;  %v1121_v38 = vpop.permute.xlu1 %1120 }
 0x194   : > { %v826_v39 = vpop.permute.xlu0 %825  ;;  %v1233_v49 = vsel %vm1215_vm6, %v1200_v22, %v1121_v38  ;;  %v522_v22 = vld [vmem:[#allocation2 + $0x1a0] sm:$0xff] }
 0x195   : > { %1807 = vmatmul.msk.f32.gmra.mxu2 %vm1253_vm7, %v1233_v49  ;;  %1030 = vrot.lane.b32.xlu1 %v2527_v12, %s1954_s10  ;;  %v2607_v46 = vsel %vm919_vm3, %v908_v33, %v826_v39 }
 0x199   : > { %1044 = vrot.lane.b32.xlu2 %v2587_v6, %s1954_s10 }
 0x19a   : > { %1128 = vrot.lane.b32.xlu0 %v2607_v46, %s1955_s11 }
 0x19b   : > { %v1037_v7 = vpop.permute.xlu2 %1036  ;;  %v1097_v42 = vpop.permute.xlu1 %1096 }
 0x19c   : > { %v997_v36 = vpop.permute.xlu0 %996  ;;  %v1207_v16 = vsel %vm1182_vm5, %v944_v44, %v1037_v7  ;;  %v1221_v13 = vsel %vm1215_vm6, %v1188_v54, %v1097_v42 }
 0x19d   : > { %v1187_v50 = vsel %vm1182_vm5, %v2283_v58, %v997_v36  ;;  %1140 = vrot.lane.b32.xlu1 %v2612_v41, %s1955_s11  ;;  %v1193_v58 = vsel %vm1182_vm5, %v2331_v32, %v1009_v63 }
 0x19e   : > { %v1220_v61 = vsel %vm1215_vm6, %v1187_v50, %v1095_v28  ;;  %v915_v28 = vsel %vm268_vm0, %v519_v59, %v696_v19 }
 0x19f   : > { %1794 = vmatmul.msk.f32.gmra.mxu0 %vm1253_vm7, %v1220_v61  ;;  %v521_v61 = vld [vmem:[#allocation2 + $0x198] sm:$0xff] }
 0x1a1   : > { %1034 = vrot.lane.b32.xlu2 %v2607_v46, %s1954_s10 }
 0x1a2   : > { %1116 = vrot.lane.b32.xlu0 %v2434_v60, %s1955_s11 }
 0x1a3   : > { %v1135_v48 = vpop.permute.xlu2 %1134  ;;  %v1025_v8 = vpop.permute.xlu1 %1024 }
 0x1a4   : > { %v1107_v53 = vpop.permute.xlu0 %1106  ;;  %v1240_v15 = vsel %vm1215_vm6, %v1207_v16, %v1135_v48 }
 0x1a5   : > { %1814 = vmatmul.msk.f32.vlgmr.msra.gmra.mxu3 %vm1253_vm7, %v1240_v15  ;;  %1032 = vrot.lane.b32.xlu1 %v944_v44, %s1954_s10  ;;  %v1226_v55 = vsel %vm1215_vm6, %v1193_v58, %v1107_v53  ;;  %v1201_v44 = vsel %vm1182_vm5, %v2376_v31, %v1025_v8 }
 0x1a6   : > { %1800 = vmatmul.msk.f32.gmra.mxu1 %vm1253_vm7, %v1226_v55 }
 0x1a7   : > { %1795 = vmatmul.msk.f32.gmra.mxu0 %vm1253_vm7, %v1221_v13 }
 0x1aa   : > { %1130 = vrot.lane.b32.xlu0 %v2474_v23, %s1955_s11 }
 0x1ab   : > { %v1099_v32 = vpop.permute.xlu2 %1098 }
 0x1ac   : > { %v840_v5 = vpop.permute.xlu0 %839 }
 0x1ad   : > { %v952_v37 = vsel %vm919_vm3, %v915_v28, %v840_v5 }
 0x1ae   : > { %1142 = vrot.lane.b32.xlu1 %v952_v37, %s1955_s11 }
 0x1b2   : > { %1046 = vrot.lane.b32.xlu0 %v2612_v41, %s1954_s10 }
 0x1b3   : > { %v1027_v20 = vpop.permute.xlu2 %1026 }
 0x1b4   : > { %v1011_v29 = vpop.permute.xlu0 %1010  ;;  %v1202_v38 = vsel %vm1182_vm5, %v2434_v60, %v1027_v20 }
 0x1b5   : > { %v1194_v52 = vsel %vm1182_vm5, %v2349_v56, %v1011_v29 }
 0x1b6   : > { %1132 = vrot.lane.b32.xlu1 %v2543_v35, %s1955_s11  ;;  %v1227_v63 = vsel %vm1215_vm6, %v1194_v52, %v1109_v62 }
 0x1b7   : > { %1801 = vmatmul.msk.f32.gmra.mxu1 %vm1253_vm7, %v1227_v63 }
 0x1ba   : > { %1048 = vrot.lane.b32.xlu0 %v952_v37, %s1954_s10 }
 0x1bb   : > { %v1125_v0 = vpop.permute.xlu2 %1124 }
 0x1bc   : > { %v698_v1 = vpop.permute.xlu0 %697  ;;  %v1235_v49 = vsel %vm1215_vm6, %v1202_v38, %v1125_v0 }
 0x1bd   : > { %v916_v9 = vsel %vm268_vm0, %v520_v30, %v698_v1 }
 0x1c3   : > { %v2651_v25 = vpop.permute.xlu2 %1014 }
 0x1c4   : > { %v842_v10 = vpop.permute.xlu0 %841 }
 0x1c5   : > { %v953_v56 = vsel %vm919_vm3, %v916_v9, %v842_v10  ;;  %v1196_v10 = vsel %vm1182_vm5, %v2397_v27, %v2651_v25 }
 0x1c6   : > { %1144 = vrot.lane.b32.xlu2 %v953_v56, %s1955_s11 }
 0x1c7   : > { %v1123_v17 = vpop.permute.xlu1 %1122 }
 0x1c8   : > { %v1234_v19 = vsel %vm1215_vm6, %v1201_v44, %v1123_v17 }
 0x1c9   : > { %1808 = vmatmul.msk.f32.gmra.mxu2 %vm1253_vm7, %v1234_v19 }
 0x1ca   : > { %v1371_v3 = vpop.f32.mrf.mxu0 }
 0x1cb   : > { %1467 = vst.msk [vmem:[%s2663_s8] sm:$0xff] %vm919_vm3, %v1371_v3  ;;  %v702_v18 = vpop.permute.xlu2 %701  ;;  %v1568_v50 = vmul.f32 %v1371_v3, %v1371_v3  ;;  %v1499_v48 = vsel %vm919_vm3, %v1371_v3, 0.0 }
 0x1cc   : > { %v1001_v51 = vpop.permute.xlu0 %1000  ;;  %v918_v24 = vsel %vm268_vm0, %v522_v22, %v702_v18 }
 0x1cd   : > { %v1189_v31 = vsel %vm1182_vm5, %v2312_v14, %v1001_v51  ;;  %v1600_v15 = vsel %vm919_vm3, %v1568_v50, 0.0 }
 0x1ce   : > { %1050 = vrot.lane.b32.xlu2 %v953_v56, %s1954_s10  ;;  %v1222_v62 = vsel %vm1215_vm6, %v1189_v31, %v1099_v32 }
 0x1cf   : > { %1796 = vmatmul.msk.f32.gmra.mxu0 %vm1253_vm7, %v1222_v62  ;;  %v1013_v39 = vpop.permute.xlu1 %1012 }
 0x1d0   : > { %v1195_v33 = vsel %vm1182_vm5, %v2352_v57, %v1013_v39 }
 0x1d1   : > { %1809 = vmatmul.msk.f32.gmra.mxu2 %vm1253_vm7, %v1235_v49 }
 0x1d2   : > { %v2678_v47 = vpop.f32.mrf.mxu1 }
 0x1d3   : > { %1475 = vst.msk [vmem:[%s2663_s8 + $0x40] sm:$0xff] %vm919_vm3, %v2678_v47  ;;  %v846_v14 = vpop.permute.xlu2 %845 }
 0x1d4   : > { %v1111_v60 = vpop.permute.xlu0 %1110  ;;  %v955_v43 = vsel %vm919_vm3, %v918_v24, %v846_v14 }
 0x1d5   : > { %1148 = vrot.lane.b32.xlu0 %v955_v43, %s1955_s11  ;;  %v1228_v7 = vsel %vm1215_vm6, %v1195_v33, %v1111_v60 }
 0x1d6   : > { %1802 = vmatmul.msk.f32.gmra.mxu1 %vm1253_vm7, %v1228_v7 }
 0x1d7   : > { %v700_v36 = vpop.permute.xlu1 %699 }
 0x1d8   : > { %v917_v54 = vsel %vm268_vm0, %v521_v61, %v700_v36 }
 0x1db   : > { %v1017_v3 = vpop.permute.xlu2 %1016 }
 0x1dc   : > { %v1374_v16 = vpop.f32.mrf.mxu0  ;;  %v1039_v42 = vpop.permute.xlu0 %1038  ;;  %v1197_v38 = vsel %vm1182_vm5, %v2459_v2, %v1017_v3 }
 0x1dd   : > { %1468 = vst.msk [vmem:[%s2663_s8 + $0x8] sm:$0xff] %vm919_vm3, %v1374_v16  ;;  %v1500_v57 = vsel %vm919_vm3, %v1374_v16, 0.0  ;;  %v1569_v58 = vmul.f32 %v1374_v16, %v1374_v16  ;;  %v1208_v28 = vsel %vm1182_vm5, %v2607_v46, %v1039_v42 }
 0x1de   : > { %v1501_v53 = vadd.f32 %v1500_v57, %v1499_v48 }
 0x1df   : > { %v1601_v55 = vsel %vm919_vm3, %v1569_v58, 0.0  ;;  %v844_v13 = vpop.permute.xlu1 %843 }
 0x1e0   : > { %v1602_v59 = vadd.f32 %v1601_v55, %v1600_v15  ;;  %v954_v32 = vsel %vm919_vm3, %v917_v54, %v844_v13 }
 0x1e1   : > { %1146 = vrot.lane.b32.xlu1 %v954_v32, %s1955_s11 }
 0x1e3   : > { %v1043_v62 = vpop.permute.xlu2 %1042 }
 0x1e4   : > { %v1377_v5 = vpop.f32.mrf.mxu0  ;;  %v1137_v37 = vpop.permute.xlu0 %1136  ;;  %v1210_v16 = vsel %vm1182_vm5, %v2543_v35, %v1043_v62 }
 0x1e5   : > { %1469 = vst.msk [vmem:[%s2663_s8 + $0x10] sm:$0xff] %vm919_vm3, %v1377_v5  ;;  %v1502_v20 = vsel %vm919_vm3, %v1377_v5, 0.0  ;;  %v1570_v29 = vmul.f32 %v1377_v5, %v1377_v5  ;;  %v1241_v52 = vsel %vm1215_vm6, %v1208_v28, %v1137_v37 }
 0x1e6   : > { %v1503_v63 = vadd.f32 %v1502_v20, %v1501_v53  ;;  %1815 = vmatmul.msk.f32.gmra.mxu3 %vm1253_vm7, %v1241_v52 }
 0x1e7   : > { %v1603_v0 = vsel %vm919_vm3, %v1570_v29, 0.0  ;;  %v1003_v1 = vpop.permute.xlu1 %1002 }
 0x1e8   : > { %v1604_v8 = vadd.f32 %v1603_v0, %v1602_v59  ;;  %v1190_v46 = vsel %vm1182_vm5, %v2365_v4, %v1003_v1 }
 0x1eb   : > { %v1019_v36 = vpop.permute.xlu2 %1018 }
 0x1ec   : > { %v1101_v30 = vpop.permute.xlu0 %1100 }
 0x1ed   : > { %v1223_v9 = vsel %vm1215_vm6, %v1190_v46, %v1101_v30 }
 0x1ee   : > { %1797 = vmatmul.msk.f32.gmra.mxu0 %vm1253_vm7, %v1223_v9 }
 0x1ef   : > { %v1113_v56 = vpop.permute.xlu1 %1112 }
 0x1f0   : > { %v1229_v44 = vsel %vm1215_vm6, %v1196_v10, %v1113_v56 }
 0x1f1   : > { %1803 = vmatmul.msk.f32.gmra.mxu1 %vm1253_vm7, %v1229_v44 }
 0x1f3   : > { %v1045_v53 = vpop.permute.xlu2 %1044 }
 0x1f4   : > { %v1029_v17 = vpop.permute.xlu0 %1028  ;;  %v1211_v37 = vsel %vm1182_vm5, %v2482_v40, %v1045_v53 }
 0x1f5   : > { %v1203_v4 = vsel %vm1182_vm5, %v2391_v26, %v1029_v17 }
 0x1f7   : > { %v1041_v19 = vpop.permute.xlu1 %1040 }
 0x1f8   : > { %v2715_v18 = vpop.f32.mrf.mxu2  ;;  %v1209_v25 = vsel %vm1182_vm5, %v2474_v23, %v1041_v19 }
 0x1f9   : > { %1483 = vst.msk [vmem:[%s2663_s8 + $0x80] sm:$0xff] %vm919_vm3, %v2715_v18 }
 0x1fc   : > { %v1127_v51 = vpop.permute.xlu0 %1126 }
 0x1fd   : > { %v1236_v27 = vsel %vm1215_vm6, %v1203_v4, %v1127_v51 }
 0x1fe   : > { %1810 = vmatmul.msk.f32.gmra.mxu2 %vm1253_vm7, %v1236_v27 }
 0x1ff   : > { %v1139_v31 = vpop.permute.xlu1 %1138 }
 0x200   : > { %v1242_v22 = vsel %vm1215_vm6, %v1209_v25, %v1139_v31 }
 0x201   : > { %1816 = vmatmul.msk.f32.gmra.mxu3 %vm1253_vm7, %v1242_v22 }
 0x204   : > { %v1380_v39 = vpop.f32.mrf.mxu0  ;;  %v1115_v26 = vpop.permute.xlu0 %1114 }
 0x205   : > { %1470 = vst.msk [vmem:[%s2663_s8 + $0x18] sm:$0xff] %vm919_vm3, %v1380_v39  ;;  %v1504_v49 = vsel %vm919_vm3, %v1380_v39, 0.0  ;;  %v1571_v24 = vmul.f32 %v1380_v39, %v1380_v39  ;;  %v1230_v14 = vsel %vm1215_vm6, %v1197_v38, %v1115_v26 }
 0x206   : > { %v1505_v23 = vadd.f32 %v1504_v49, %v1503_v63  ;;  %1804 = vmatmul.msk.f32.gmra.mxu1 %vm1253_vm7, %v1230_v14 }
 0x207   : > { %v1605_v33 = vsel %vm919_vm3, %v1571_v24, 0.0  ;;  %v1031_v60 = vpop.permute.xlu1 %1030 }
 0x208   : > { %v1606_v43 = vadd.f32 %v1605_v33, %v1604_v8  ;;  %v1204_v2 = vsel %vm1182_vm5, %v2409_v45, %v1031_v60  ;;  %v1198_v45 = vsel %vm1182_vm5, %v2466_v11, %v1019_v36 }
 0x20b   : > { %v2736_v7 = vpop.f32.mrf.mxu1 }
 0x20c   : > { %1476 = vst.msk [vmem:[%s2663_s8 + $0x48] sm:$0xff] %vm919_vm3, %v2736_v7  ;;  %v1129_v50 = vpop.permute.xlu0 %1128 }
 0x20d   : > { %v1237_v61 = vsel %vm1215_vm6, %v1204_v2, %v1129_v50  ;;  %v1576_v2 = vmul.f32 %v2678_v47, %v2678_v47 }
 0x20e   : > { %1811 = vmatmul.msk.f32.gmra.mxu2 %vm1253_vm7, %v1237_v61 }
 0x20f   : > { %v1141_v42 = vpop.permute.xlu1 %1140  ;;  %v1615_v53 = vsel %vm919_vm3, %v1576_v2, 0.0 }
 0x210   : > { %v1243_v48 = vsel %vm1215_vm6, %v1210_v16, %v1141_v42  ;;  %v1514_v16 = vsel %vm919_vm3, %v2678_v47, 0.0  ;;  %v1577_v42 = vmul.f32 %v2736_v7, %v2736_v7 }
 0x211   : > { %1817 = vmatmul.msk.f32.gmra.mxu3 %vm1253_vm7, %v1243_v48 }
 0x214   : > { %v1117_v57 = vpop.permute.xlu0 %1116 }
 0x215   : > { %v1231_v58 = vsel %vm1215_vm6, %v1198_v45, %v1117_v57 }
 0x216   : > { %1805 = vmatmul.msk.f32.gmra.mxu1 %vm1253_vm7, %v1231_v58 }
 0x217   : > { %v1033_v15 = vpop.permute.xlu1 %1032 }
 0x218   : > { %v2753_v54 = vpop.f32.mrf.mxu2  ;;  %v1205_v35 = vsel %vm1182_vm5, %v2503_v34, %v1033_v15  ;;  %v1035_v34 = vpop.permute.xlu2 %1034  ;;  %v1516_v15 = vsel %vm919_vm3, %v2736_v7, 0.0 }
 0x219   : > { %1484 = vst.msk [vmem:[%s2663_s8 + $0x88] sm:$0xff] %vm919_vm3, %v2753_v54  ;;  %v1206_v10 = vsel %vm1182_vm5, %v2527_v12, %v1035_v34 }
 0x21c   : > { %v1383_v55 = vpop.f32.mrf.mxu0  ;;  %v1131_v13 = vpop.permute.xlu0 %1130 }
 0x21d   : > { %1471 = vst.msk [vmem:[%s2663_s8 + $0x20] sm:$0xff] %vm919_vm3, %v1383_v55  ;;  %v1506_v11 = vsel %vm919_vm3, %v1383_v55, 0.0  ;;  %v1572_v59 = vmul.f32 %v1383_v55, %v1383_v55  ;;  %v1238_v32 = vsel %vm1215_vm6, %v1205_v35, %v1131_v13  ;;  %v1617_v13 = vsel %vm919_vm3, %v1577_v42, 0.0 }
 0x21e   : > { %v1507_v28 = vadd.f32 %v1506_v11, %v1505_v23  ;;  %1812 = vmatmul.msk.f32.gmra.mxu2 %vm1253_vm7, %v1238_v32 }
 0x21f   : > { %v1607_v5 = vsel %vm919_vm3, %v1572_v59, 0.0 }
 0x220   : > { %v1608_v20 = vadd.f32 %v1607_v5, %v1606_v43  ;;  %v1143_v29 = vpop.permute.xlu1 %1142  ;;  %v1145_v56 = vpop.permute.xlu2 %1144 }
 0x221   : > { %v1244_v52 = vsel %vm1215_vm6, %v1211_v37, %v1143_v29 }
 0x222   : > { %1818 = vmatmul.msk.f32.gmra.mxu3 %vm1253_vm7, %v1244_v52 }
 0x223   : > { %v2770_v63 = vpop.f32.mrf.mxu1 }
 0x224   : > { %1477 = vst.msk [vmem:[%s2663_s8 + $0x50] sm:$0xff] %vm919_vm3, %v2770_v63  ;;  %v1386_v0 = vpop.f32.mrf.mxu0  ;;  %v1047_v1 = vpop.permute.xlu0 %1046  ;;  %v1578_v35 = vmul.f32 %v2770_v63, %v2770_v63  ;;  %v1518_v11 = vsel %vm919_vm3, %v2770_v63, 0.0 }
 0x225   : > { %1472 = vst.msk [vmem:[%s2663_s8 + $0x28] sm:$0xff] %vm919_vm3, %v1386_v0  ;;  %v1508_v8 = vsel %vm919_vm3, %v1386_v0, 0.0  ;;  %v1573_v40 = vmul.f32 %v1386_v0, %v1386_v0  ;;  %v1212_v30 = vsel %vm1182_vm5, %v2550_v21, %v1047_v1 }
 0x226   : > { %v1509_v46 = vadd.f32 %v1508_v8, %v1507_v28  ;;  %v1245_v4 = vsel %vm1215_vm6, %v1212_v30, %v1145_v56  ;;  %v1619_v5 = vsel %vm919_vm3, %v1578_v35, 0.0 }
 0x227   : > { %v1609_v9 = vsel %vm919_vm3, %v1573_v40, 0.0 }
 0x228   : > { %v1610_v44 = vadd.f32 %v1609_v9, %v1608_v20  ;;  %v1133_v17 = vpop.permute.xlu1 %1132  ;;  %v2783_v19 = vpop.f32.mrf.mxu3 }
 0x229   : > { %v1239_v3 = vsel %vm1215_vm6, %v1206_v10, %v1133_v17  ;;  %1491 = vst.msk [vmem:[%s2663_s8 + $0xc0] sm:$0xff] %vm919_vm3, %v2783_v19  ;;  %v1051_v23 = vpop.permute.xlu2 %1050 }
 0x22a   : > { %1813 = vmatmul.msk.f32.gmra.mxu2 %vm1253_vm7, %v1239_v3  ;;  %1819 = vmatmul.msk.f32.gmra.mxu3 %vm1253_vm7, %v1245_v4  ;;  %v1214_v60 = vsel %vm1182_vm5, %v2612_v41, %v1051_v23 }
 0x22c   : > { %v1049_v62 = vpop.permute.xlu0 %1048 }
 0x22d   : > { %v1213_v39 = vsel %vm1182_vm5, %v2587_v6, %v1049_v62 }
 0x234   : > { %v1404_v21 = vpop.f32.mrf.mxu1 }
 0x235   : > { %1478 = vst.msk [vmem:[%s2663_s8 + $0x58] sm:$0xff] %vm919_vm3, %v1404_v21  ;;  %v1579_v59 = vmul.f32 %v1404_v21, %v1404_v21  ;;  %v1520_v37 = vsel %vm919_vm3, %v1404_v21, 0.0 }
 0x237   : > { %v1621_v29 = vsel %vm919_vm3, %v1579_v59, 0.0 }
 0x247   : > { %v1149_v33 = vpop.permute.xlu0 %1148 }
 0x248   : > { %v1247_v6 = vsel %vm1215_vm6, %v1214_v60, %v1149_v33 }
 0x24c   : > { %v1389_v12 = vpop.f32.mrf.mxu0  ;;  %v2794_v51 = vpop.f32.mrf.mxu2 }
 0x24d   : > { %1473 = vst.msk [vmem:[%s2663_s8 + $0x30] sm:$0xff] %vm919_vm3, %v1389_v12  ;;  %v1510_v27 = vsel %vm919_vm3, %v1389_v12, 0.0  ;;  %v1574_v25 = vmul.f32 %v1389_v12, %v1389_v12  ;;  %v1586_v2 = vmul.f32 %v2794_v51, %v2794_v51 }
 0x24e   : > { %v1511_v31 = vadd.f32 %v1510_v27, %v1509_v46  ;;  %1485 = vst.msk [vmem:[%s2663_s8 + $0x90] sm:$0xff] %vm919_vm3, %v2794_v51 }
 0x24f   : > { %v1611_v22 = vsel %vm919_vm3, %v1574_v25, 0.0 }
 0x250   : > { %v1612_v38 = vadd.f32 %v1611_v22, %v1610_v44 }
 0x253   : > { %v1407_v26 = vpop.f32.mrf.mxu1  ;;  %v1147_v49 = vpop.permute.xlu1 %1146 }
 0x254   : > { %1479 = vst.msk [vmem:[%s2663_s8 + $0x60] sm:$0xff] %vm919_vm3, %v1407_v26  ;;  %v2807_v24 = vpop.f32.mrf.mxu2  ;;  %v1246_v14 = vsel %vm1215_vm6, %v1213_v39, %v1147_v49  ;;  %v1580_v34 = vmul.f32 %v1407_v26, %v1407_v26  ;;  %v1522_v52 = vsel %vm919_vm3, %v1407_v26, 0.0  ;;  %v1530_v49 = vsel %vm919_vm3, %v2715_v18, 0.0 }
 0x255   : > { %1486 = vst.msk [vmem:[%s2663_s8 + $0x98] sm:$0xff] %vm919_vm3, %v2807_v24  ;;  %1820 = vmatmul.msk.f32.gmra.mxu3 %vm1253_vm7, %v1246_v14  ;;  %v1585_v14 = vmul.f32 %v2753_v54, %v2753_v54 }
 0x256   : > { %v1623_v8 = vsel %vm919_vm3, %v1580_v34, 0.0 }
 0x25d   : > { %1821 = vmatmul.msk.f32.gmra.mxu3 %vm1253_vm7, %v1247_v6 }
 0x269   : > { %v2818_v43 = vpop.f32.mrf.mxu3 }
 0x26a   : > { %1492 = vst.msk [vmem:[%s2663_s8 + $0xc8] sm:$0xff] %vm919_vm3, %v2818_v43 }
 0x26b   : > { %v1392_v36 = vpop.f32.mrf.mxu0 }
 0x26c   : > { %1474 = vst.msk [vmem:[%s2663_s8 + $0x38] sm:$0xff] %vm919_vm3, %v1392_v36  ;;  %v1512_v50 = vsel %vm919_vm3, %v1392_v36, 0.0  ;;  %v1575_v61 = vmul.f32 %v1392_v36, %v1392_v36  ;;  %v1532_v36 = vsel %vm919_vm3, %v2753_v54, 0.0  ;;  %v1536_v54 = vsel %vm919_vm3, %v2807_v24, 0.0 }
 0x26d   : > { %v1513_v41 = vadd.f32 %v1512_v50, %v1511_v31  ;;  %v1584_v31 = vmul.f32 %v2715_v18, %v2715_v18  ;;  %v1534_v18 = vsel %vm919_vm3, %v2794_v51, 0.0 }
 0x26e   : > { %v1613_v48 = vsel %vm919_vm3, %v1575_v61, 0.0  ;;  %v1410_v45 = vpop.f32.mrf.mxu1 }
 0x26f   : > { %v1515_v57 = vadd.f32 %v1514_v16, %v1513_v41  ;;  %v1614_v58 = vadd.f32 %v1613_v48, %v1612_v38  ;;  %1480 = vst.msk [vmem:[%s2663_s8 + $0x68] sm:$0xff] %vm919_vm3, %v1410_v45  ;;  %v1581_v0 = vmul.f32 %v1410_v45, %v1410_v45  ;;  %v1524_v40 = vsel %vm919_vm3, %v1410_v45, 0.0 }
 0x270   : > { %v1631_v6 = vsel %vm919_vm3, %v1584_v31, 0.0  ;;  %v1633_v41 = vsel %vm919_vm3, %v1585_v14, 0.0  ;;  %v1587_v16 = vmul.f32 %v2807_v24, %v2807_v24  ;;  %v1635_v45 = vsel %vm919_vm3, %v1586_v2, 0.0 }
 0x271   : > { %v1517_v55 = vadd.f32 %v1516_v15, %v1515_v57  ;;  %v1616_v47 = vadd.f32 %v1615_v53, %v1614_v58  ;;  %v1625_v9 = vsel %vm919_vm3, %v1581_v0, 0.0 }
 0x272   : > { %v1637_v15 = vsel %vm919_vm3, %v1587_v16, 0.0 }
 0x273   : > { %v1519_v32 = vadd.f32 %v1518_v11, %v1517_v55  ;;  %v1618_v28 = vadd.f32 %v1617_v13, %v1616_v47 }
 0x275   : > { %v1620_v7 = vadd.f32 %v1619_v5, %v1618_v28  ;;  %v1521_v20 = vadd.f32 %v1520_v37, %v1519_v32 }
 0x277   : > { %v1523_v1 = vadd.f32 %v1522_v52, %v1521_v20  ;;  %v1622_v63 = vadd.f32 %v1621_v29, %v1620_v7 }
 0x279   : > { %v1525_v46 = vadd.f32 %v1524_v40, %v1523_v1  ;;  %v1624_v30 = vadd.f32 %v1623_v8, %v1622_v63  ;;  %v1592_v1 = vmul.f32 %v2783_v19, %v2783_v19 }
 0x27b   : > { %v1626_v10 = vadd.f32 %v1625_v9, %v1624_v30  ;;  %v1546_v30 = vsel %vm919_vm3, %v2783_v19, 0.0  ;;  %v1593_v9 = vmul.f32 %v2818_v43, %v2818_v43 }
 0x27d   : > { %v1649_v19 = vsel %vm919_vm3, %v1593_v9, 0.0 }
 0x281   : > { %v1431_v56 = vpop.f32.mrf.mxu2 }
 0x282   : > { %1487 = vst.msk [vmem:[%s2663_s8 + $0xa0] sm:$0xff] %vm919_vm3, %v1431_v56  ;;  %v1588_v57 = vmul.f32 %v1431_v56, %v1431_v56  ;;  %v1538_v35 = vsel %vm919_vm3, %v1431_v56, 0.0 }
 0x283   : > { %v1413_v44 = vpop.f32.mrf.mxu1 }
 0x284   : > { %1481 = vst.msk [vmem:[%s2663_s8 + $0x70] sm:$0xff] %vm919_vm3, %v1413_v44  ;;  %v2854_v17 = vpop.f32.mrf.mxu3  ;;  %v1582_v3 = vmul.f32 %v1413_v44, %v1413_v44  ;;  %v1526_v4 = vsel %vm919_vm3, %v1413_v44, 0.0  ;;  %v1639_v47 = vsel %vm919_vm3, %v1588_v57, 0.0 }
 0x285   : > { %1493 = vst.msk [vmem:[%s2663_s8 + $0xd0] sm:$0xff] %vm919_vm3, %v2854_v17  ;;  %v1527_v27 = vadd.f32 %v1526_v4, %v1525_v46  ;;  %v1548_v4 = vsel %vm919_vm3, %v2818_v43, 0.0 }
 0x286   : > { %v1627_v12 = vsel %vm919_vm3, %v1582_v3, 0.0  ;;  %v1647_v3 = vsel %vm919_vm3, %v1592_v1, 0.0 }
 0x287   : > { %v1628_v39 = vadd.f32 %v1627_v12, %v1626_v10 }
 0x291   : > { %v1434_v21 = vpop.f32.mrf.mxu2 }
 0x292   : > { %1488 = vst.msk [vmem:[%s2663_s8 + $0xa8] sm:$0xff] %vm919_vm3, %v1434_v21  ;;  %v1589_v32 = vmul.f32 %v1434_v21, %v1434_v21  ;;  %v1540_v24 = vsel %vm919_vm3, %v1434_v21, 0.0  ;;  %v1594_v21 = vmul.f32 %v2854_v17, %v2854_v17 }
 0x293   : > { %v1416_v25 = vpop.f32.mrf.mxu1 }
 0x294   : > { %1482 = vst.msk [vmem:[%s2663_s8 + $0x78] sm:$0xff] %vm919_vm3, %v1416_v25  ;;  %v1528_v22 = vsel %vm919_vm3, %v1416_v25, 0.0  ;;  %v1583_v62 = vmul.f32 %v1416_v25, %v1416_v25  ;;  %v2868_v38 = vpop.f32.mrf.mxu3  ;;  %v1641_v37 = vsel %vm919_vm3, %v1589_v32, 0.0  ;;  %v1550_v25 = vsel %vm919_vm3, %v2854_v17, 0.0 }
 0x295   : > { %v1529_v26 = vadd.f32 %v1528_v22, %v1527_v27  ;;  %1494 = vst.msk [vmem:[%s2663_s8 + $0xd8] sm:$0xff] %vm919_vm3, %v2868_v38  ;;  %v1595_v31 = vmul.f32 %v2868_v38, %v2868_v38  ;;  %v1552_v43 = vsel %vm919_vm3, %v2868_v38, 0.0 }
 0x296   : > { %v1629_v23 = vsel %vm919_vm3, %v1583_v62, 0.0 }
 0x297   : > { %v1531_v33 = vadd.f32 %v1530_v49, %v1529_v26  ;;  %v1630_v60 = vadd.f32 %v1629_v23, %v1628_v39  ;;  %v1651_v39 = vsel %vm919_vm3, %v1594_v21, 0.0  ;;  %v1653_v14 = vsel %vm919_vm3, %v1595_v31, 0.0 }
 0x299   : > { %v1533_v50 = vadd.f32 %v1532_v36, %v1531_v33  ;;  %v1632_v61 = vadd.f32 %v1631_v6, %v1630_v60 }
 0x29b   : > { %v1535_v42 = vadd.f32 %v1534_v18, %v1533_v50  ;;  %v1634_v48 = vadd.f32 %v1633_v41, %v1632_v61 }
 0x29d   : > { %v1636_v58 = vadd.f32 %v1635_v45, %v1634_v48  ;;  %v1537_v53 = vadd.f32 %v1536_v54, %v1535_v42 }
 0x29f   : > { %v1539_v51 = vadd.f32 %v1538_v35, %v1537_v53  ;;  %v1638_v55 = vadd.f32 %v1637_v15, %v1636_v58 }
 0x2a1   : > { %v1437_v13 = vpop.f32.mrf.mxu2  ;;  %v1640_v11 = vadd.f32 %v1639_v47, %v1638_v55  ;;  %v1541_v5 = vadd.f32 %v1540_v24, %v1539_v51 }
 0x2a2   : > { %1489 = vst.msk [vmem:[%s2663_s8 + $0xb0] sm:$0xff] %vm919_vm3, %v1437_v13  ;;  %v1590_v28 = vmul.f32 %v1437_v13, %v1437_v13  ;;  %v1542_v34 = vsel %vm919_vm3, %v1437_v13, 0.0 }
 0x2a3   : > { %v1642_v7 = vadd.f32 %v1641_v37, %v1640_v11  ;;  %v1543_v29 = vadd.f32 %v1542_v34, %v1541_v5 }
 0x2a4   : > { %v1643_v20 = vsel %vm919_vm3, %v1590_v28, 0.0 }
 0x2a5   : > { %v1455_v59 = vpop.f32.mrf.mxu3  ;;  %v1644_v40 = vadd.f32 %v1643_v20, %v1642_v7 }
 0x2a6   : > { %1495 = vst.msk [vmem:[%s2663_s8 + $0xe0] sm:$0xff] %vm919_vm3, %v1455_v59  ;;  %v1596_v33 = vmul.f32 %v1455_v59, %v1455_v59  ;;  %v1554_v17 = vsel %vm919_vm3, %v1455_v59, 0.0 }
 0x2a8   : > { %v1655_v36 = vsel %vm919_vm3, %v1596_v33, 0.0 }
 0x2ad   : > { %v1440_v52 = vpop.f32.mrf.mxu2  ;;  %v1458_v0 = vpop.f32.mrf.mxu3 }
 0x2ae   : > { %1490 = vst.msk [vmem:[%s2663_s8 + $0xb8] sm:$0xff] %vm919_vm3, %v1440_v52  ;;  %v1544_v63 = vsel %vm919_vm3, %v1440_v52, 0.0  ;;  %v1591_v8 = vmul.f32 %v1440_v52, %v1440_v52  ;;  %v1597_v2 = vmul.f32 %v1458_v0, %v1458_v0  ;;  %v1556_v38 = vsel %vm919_vm3, %v1458_v0, 0.0 }
 0x2af   : > { %v1545_v46 = vadd.f32 %v1544_v63, %v1543_v29  ;;  %1496 = vst.msk [vmem:[%s2663_s8 + $0xe8] sm:$0xff] %vm919_vm3, %v1458_v0 }
 0x2b0   : > { %v1645_v10 = vsel %vm919_vm3, %v1591_v8, 0.0  ;;  %v1657_v16 = vsel %vm919_vm3, %v1597_v2, 0.0 }
 0x2b1   : > { %v1547_v56 = vadd.f32 %v1546_v30, %v1545_v46  ;;  %v1646_v44 = vadd.f32 %v1645_v10, %v1644_v40 }
 0x2b3   : > { %v1549_v12 = vadd.f32 %v1548_v4, %v1547_v56  ;;  %v1648_v27 = vadd.f32 %v1647_v3, %v1646_v44 }
 0x2b5   : > { %v1551_v22 = vadd.f32 %v1550_v25, %v1549_v12  ;;  %v1650_v62 = vadd.f32 %v1649_v19, %v1648_v27 }
 0x2b7   : > { %v1652_v26 = vadd.f32 %v1651_v39, %v1650_v62  ;;  %v1553_v49 = vadd.f32 %v1552_v43, %v1551_v22 }
 0x2b9   : > { %v1654_v23 = vadd.f32 %v1653_v14, %v1652_v26  ;;  %v1555_v6 = vadd.f32 %v1554_v17, %v1553_v49 }
 0x2bb   : > { %v1656_v61 = vadd.f32 %v1655_v36, %v1654_v23  ;;  %v1557_v18 = vadd.f32 %v1556_v38, %v1555_v6 }
 0x2bd   : > { %v1658_v48 = vadd.f32 %v1657_v16, %v1656_v61 }
 0x2d8   : > { %v1461_v60 = vpop.f32.mrf.mxu3 }
 0x2d9   : > { %1497 = vst.msk [vmem:[%s2663_s8 + $0xf0] sm:$0xff] %vm919_vm3, %v1461_v60  ;;  %v1598_v50 = vmul.f32 %v1461_v60, %v1461_v60  ;;  %v1558_v41 = vsel %vm919_vm3, %v1461_v60, 0.0 }
 0x2da   : > { %v1559_v45 = vadd.f32 %v1558_v41, %v1557_v18 }
 0x2db   : > { %v1659_v42 = vsel %vm919_vm3, %v1598_v50, 0.0 }
 0x2dc   : > { %v1660_v53 = vadd.f32 %v1659_v42, %v1658_v48 }
 0x2e0   : > { %v1464_v54 = vpop.f32.mrf.mxu3 }
 0x2e1   : > { %1498 = vst.msk [vmem:[%s2663_s8 + $0xf8] sm:$0xff] %vm919_vm3, %v1464_v54  ;;  %v1560_v57 = vsel %vm919_vm3, %v1464_v54, 0.0  ;;  %v1599_v58 = vmul.f32 %v1464_v54, %v1464_v54 }
 0x2e2   : > { %v1561_v15 = vadd.f32 %v1560_v57, %v1559_v45 }
 0x2e3   : > { %v1661_v35 = vsel %vm919_vm3, %v1599_v58, 0.0 }
 0x2e4   : > { %v1562_v51 = vrot.slane %v1561_v15, 4  ;;  %v1662_v55 = vadd.f32 %v1661_v35, %v1660_v53 }
 0x2e6   : > { %v1563_v47 = vadd.f32 %v1562_v51, %v1561_v15  ;;  %v1663_v13 = vrot.slane %v1662_v55, 4 }
 0x2e8   : > { %v1564_v11 = vrot.slane %v1563_v47, 2  ;;  %v1664_v59 = vadd.f32 %v1663_v13, %v1662_v55 }
 0x2ea   : > { %v1565_v32 = vadd.f32 %v1564_v11, %v1563_v47  ;;  %v1665_v24 = vrot.slane %v1664_v59, 2 }
 0x2ec   : > { %v1566_v28 = vrot.slane %v1565_v32, 1  ;;  %v1666_v5 = vadd.f32 %v1665_v24, %v1664_v59 }
 0x2ee   : > { %v1667_v37 = vrot.slane %v1666_v5, 1  ;;  %v1567_v34 = vadd.f32 %v1566_v28, %v1565_v32 }
 0x2f0   : > { %v1668_v7 = vadd.f32 %v1667_v37, %v1666_v5 }
 0x2f2   : > { %v1669_v20 = vsel %vm309_vm2, %v1567_v34, %v1668_v7 }
 0x2f3   : > { %1671 = vst.msk [vmem:[%s225_s13] sm:$0x3] %vm1670_vm8, %v1669_v20 }
 0x2f4   : > { %1914 = shalt.err (!%p1911_p3)
}
 0x2f5   : > { %1843 = dma.vmem_to_hbm [thread:$0]  (%p2024_p5), %s1694_s14, 32, %s1696_s15, %s1678_s2  }
 0x2f6 PF: > { %p1849_p4 = scmp.ge.s32.totalorder %s1949_s21, 2  ;;  %s1715_s7 = sand.u32 1, %s1937_s18  }
 0x2f7   : > { %s1716_s8 = scalar_lea.sflag [#allocation4], %s1715_s7 }
 0x2f8   : > { %p1846_p7 = pnand %p1849_p4, %p2028_p6 }
 0x2fa   : > { %p1847_p8 = pneg %p1846_p7 }
 0x2fc   : > { %1932 = dma.done.wait (%p1847_p8), %s1716_s8, 32  }
 0x2fd   : > { %1934 = vsyncadd (%p1847_p8), %s1716_s8, 4294967264  ;;  %p16_p9 = scmp.ge.s32.totalorder %s2011_s22, 4   ;;  %s2981_s18 = smov %s1941_s19 }
 0x2fe   : > { %s2982_s19 = smov %s1945_s20  ;;  %s2983_s20 = smov %s2022_s25 }
 0x2ff   : > { %s2984_s21 = smov %s2011_s22  ;;  %18 = sbr.rel (!%p16_p9) target bundleno = 3 (0x3), region = 85 }
 0x304   :  { %1722 = vsyncpa [#allocation4], 1 }
 0x305   :  { %1724 = vsyncpa [#allocation4 + $0x1], 1 }

</bundles_post_ra>
